<compile_context>
chip_gen: v7x
topology: tpu7x:2x2x1
jax: 0.10.0
libtpu: 0.0.40
codegen_flags: <defaults>
</compile_context>

<pallas_src>
import jax
import jax.numpy as jnp
from jax.experimental import pallas as pl
from jax.experimental.pallas import tpu as pltpu

EPS = 1e-5


def _bn_kernel(x_ref, gamma_ref, beta_ref, o_ref):
    # x_ref: (R, c_tile) with R = N*H*W rows on sublanes, channels on lanes.
    # gamma_ref / beta_ref: (1, c_tile)
    x = x_ref[...].astype(jnp.float32)
    r = x.shape[0]
    inv_count = jnp.float32(1.0 / r)

    # Per-channel batch statistics: single fused sublane-axis reduction per pass.
    mean = jnp.sum(x, axis=0, keepdims=True) * inv_count            # (1, c_tile)
    centered = x - mean                                             # only feeds the var sum
    var = jnp.sum(centered * centered, axis=0, keepdims=True) * inv_count

    # Fold affine + normalization into a single per-channel scale/shift so the
    # elementwise pass reads the original x block directly (no centered temp).
    scale = jax.lax.rsqrt(var + jnp.float32(EPS)) * gamma_ref[...].astype(jnp.float32)
    shift = beta_ref[...].astype(jnp.float32) - mean * scale
    o_ref[...] = (x * scale + shift).astype(o_ref.dtype)


def _choose_channel_blocks(r, c, dtype):
    """Pick a lane-dense channel split: prefer >=2 blocks (v7x megacore) that fit VMEM."""
    itemsize = jnp.dtype(dtype).itemsize
    r_pad = pl.cdiv(r, 8) * 8                 # sublane padding (f32 working precision)
    vmem_budget = 24 * 1024 * 1024            # headroom under the 32 MiB scoped default

    def fits(c_tile):
        # in + out blocks, double-buffered, plus ~2 tile-sized f32 intermediates
        # (the f32 working copy and the centered temp feeding the variance sum).
        io_bytes = 4 * r_pad * c_tile * itemsize
        work_bytes = 2 * r_pad * c_tile * 4
        return io_bytes + work_bytes <= vmem_budget

    # Candidate block counts: c_tile must divide C and stay a multiple of 128
    # (lane-dense, unmasked stores).  If C itself is not a multiple of 128, fall
    # back to a single full-extent block (allowed by the (8,128) rule).
    candidates = [nb for nb in range(1, c // 128 + 1)
                  if c % nb == 0 and (c // nb) % 128 == 0]
    if not candidates:
        return 1, c

    # Prefer the smallest block count >= 2 that fits (feeds both v7x cores and
    # gives the BlockSpec pipeline something to overlap); otherwise smallest
    # that fits; otherwise the finest split available.
    for nb in candidates:
        if nb >= 2 and fits(c // nb):
            return nb, c // nb
    for nb in candidates:
        if fits(c // nb):
            return nb, c // nb
    nb = candidates[-1]
    return nb, c // nb


def batchnorm2d(x_nchw, gamma, beta):
    """Training-mode BatchNorm2d forward on an NCHW input (batch statistics)."""
    N, C, H, W = x_nchw.shape
    R = N * H * W

    # Channel-last slab: channels on the lane axis, spatial rows on sublanes.
    x2d = jnp.transpose(x_nchw, (0, 2, 3, 1)).reshape(R, C)
    gamma2d = gamma.reshape(1, C)
    beta2d = beta.reshape(1, C)

    n_blocks, c_tile = _choose_channel_blocks(R, C, x_nchw.dtype)

    out2d = pl.pallas_call(
        _bn_kernel,
        out_shape=jax.ShapeDtypeStruct((R, C), x_nchw.dtype),
        grid_spec=pltpu.PrefetchScalarGridSpec(
            num_scalar_prefetch=0,
            grid=(n_blocks,),
            in_specs=[
                pl.BlockSpec((R, c_tile), lambda i: (0, i)),
                pl.BlockSpec((1, c_tile), lambda i: (0, i)),
                pl.BlockSpec((1, c_tile), lambda i: (0, i)),
            ],
            out_specs=pl.BlockSpec((R, c_tile), lambda i: (0, i)),
        ),
        compiler_params=pltpu.CompilerParams(
            dimension_semantics=("parallel",),
            vmem_limit_bytes=32 * 1024 * 1024,
        ),
    )(x2d, gamma2d, beta2d)

    return jnp.transpose(out2d.reshape(N, H, W, C), (0, 3, 1, 2))


def _reference_bn(x_nchw, gamma, beta):
    x = x_nchw.astype(jnp.float32)
    mean = jnp.mean(x, axis=(0, 2, 3), keepdims=True)
    var = jnp.mean((x - mean) ** 2, axis=(0, 2, 3), keepdims=True)
    g = gamma.reshape(1, -1, 1, 1)
    b = beta.reshape(1, -1, 1, 1)
    return ((x - mean) * jax.lax.rsqrt(var + EPS) * g + b).astype(x_nchw.dtype)


if __name__ == "__main__":
    key = jax.random.PRNGKey(0)
    kx, kg, kb = jax.random.split(key, 3)

    N, C, H, W = 1, 2304, 7, 7
    x = jax.random.normal(kx, (N, C, H, W), dtype=jnp.float32)
    # Deterministic affine parameters (synthetic; not the default ones/zeros so
    # the affine path is actually exercised).
    gamma = 1.0 + 0.1 * jax.random.normal(kg, (C,), dtype=jnp.float32)
    beta = 0.1 * jax.random.normal(kb, (C,), dtype=jnp.float32)

    out = batchnorm2d(x, gamma, beta)
    out = jax.block_until_ready(out)

    ref = _reference_bn(x, gamma, beta)
    assert out.shape == (N, C, H, W)
    assert jnp.allclose(out, ref, atol=1e-4, rtol=1e-4), "mismatch vs reference"

    print("KERNEL_OK")
</pallas_src>

<mosaic_0001>
module attributes {stable_mosaic.version = 11 : i64} {
  func.func @_bn_kernel(%arg0: i32, %arg1: memref<49x1152xf32, #tpu.memory_space<vmem>>, %arg2: memref<1x1152xf32, #tpu.memory_space<vmem>>, %arg3: memref<1x1152xf32, #tpu.memory_space<vmem>>, %arg4: memref<49x1152xf32, #tpu.memory_space<vmem>>) attributes {dimension_semantics = [#tpu.dimension_semantics<parallel>], iteration_bounds = array<i64: 2>, scalar_prefetch = 0 : i64, scratch_operands = 0 : i64, tpu.core_type = #tpu.core_type<tc>, window_params = [{transform_indices = @transform_0, window_bounds = array<i64: 49, 1152>}, {transform_indices = @transform_1, window_bounds = array<i64: 1, 1152>}, {transform_indices = @transform_2, window_bounds = array<i64: 1, 1152>}, {transform_indices = @transform_3, window_bounds = array<i64: 49, 1152>}]} {
    %c0 = arith.constant 0 : index
    %c0_0 = arith.constant 0 : index
    %0 = vector.load %arg1[%c0, %c0_0] : memref<49x1152xf32, #tpu.memory_space<vmem>>, vector<49x1152xf32>
    %cst = arith.constant dense<0.000000e+00> : vector<1152xf32>
    %1 = vector.multi_reduction <add>, %0, %cst [0] : vector<49x1152xf32> to vector<1152xf32>
    %2 = vector.shape_cast %1 : vector<1152xf32> to vector<1x1152xf32>
    %cst_1 = arith.constant 0.0204081628 : f32
    %3 = vector.broadcast %cst_1 : f32 to vector<1x1152xf32>
    %4 = arith.mulf %2, %3 : vector<1x1152xf32>
    %5 = vector.broadcast %4 : vector<1x1152xf32> to vector<49x1152xf32>
    %6 = arith.subf %0, %5 : vector<49x1152xf32>
    %7 = arith.mulf %6, %6 : vector<49x1152xf32>
    %cst_2 = arith.constant dense<0.000000e+00> : vector<1152xf32>
    %8 = vector.multi_reduction <add>, %7, %cst_2 [0] : vector<49x1152xf32> to vector<1152xf32>
    %9 = vector.shape_cast %8 : vector<1152xf32> to vector<1x1152xf32>
    %cst_3 = arith.constant 0.0204081628 : f32
    %10 = vector.broadcast %cst_3 : f32 to vector<1x1152xf32>
    %11 = arith.mulf %9, %10 : vector<1x1152xf32>
    %cst_4 = arith.constant 9.99999974E-6 : f32
    %12 = vector.broadcast %cst_4 : f32 to vector<1x1152xf32>
    %13 = arith.addf %11, %12 : vector<1x1152xf32>
    %14 = math.rsqrt %13 : vector<1x1152xf32>
    %c0_5 = arith.constant 0 : index
    %c0_6 = arith.constant 0 : index
    %15 = vector.load %arg2[%c0_5, %c0_6] : memref<1x1152xf32, #tpu.memory_space<vmem>>, vector<1x1152xf32>
    %16 = arith.mulf %14, %15 : vector<1x1152xf32>
    %c0_7 = arith.constant 0 : index
    %c0_8 = arith.constant 0 : index
    %17 = vector.load %arg3[%c0_7, %c0_8] : memref<1x1152xf32, #tpu.memory_space<vmem>>, vector<1x1152xf32>
    %18 = arith.mulf %4, %16 : vector<1x1152xf32>
    %19 = arith.subf %17, %18 : vector<1x1152xf32>
    %20 = vector.broadcast %16 : vector<1x1152xf32> to vector<49x1152xf32>
    %21 = arith.mulf %0, %20 : vector<49x1152xf32>
    %22 = vector.broadcast %19 : vector<1x1152xf32> to vector<49x1152xf32>
    %23 = arith.addf %21, %22 : vector<49x1152xf32>
    %c0_9 = arith.constant 0 : index
    %c0_10 = arith.constant 0 : index
    %24 = vector.load %arg4[%c0_9, %c0_10] : memref<49x1152xf32, #tpu.memory_space<vmem>>, vector<49x1152xf32>
    tpu.vector_store %arg4[%c0_9, %c0_10], %23 {strides = array<i32>} : memref<49x1152xf32, #tpu.memory_space<vmem>>, vector<49x1152xf32>,
    return
  }
  func.func @transform_0(%arg0: i32) -> (i32, i32) {
    %c0_i32 = arith.constant 0 : i32
    %c0_i32_0 = arith.constant 0 : i32
    return %c0_i32, %arg0 : i32, i32
  }
  func.func @transform_1(%arg0: i32) -> (i32, i32) {
    %c0_i32 = arith.constant 0 : i32
    %c0_i32_0 = arith.constant 0 : i32
    return %c0_i32, %arg0 : i32, i32
  }
  func.func @transform_2(%arg0: i32) -> (i32, i32) {
    %c0_i32 = arith.constant 0 : i32
    %c0_i32_0 = arith.constant 0 : i32
    return %c0_i32, %arg0 : i32, i32
  }
  func.func @transform_3(%arg0: i32) -> (i32, i32) {
    %c0_i32 = arith.constant 0 : i32
    %c0_i32_0 = arith.constant 0 : i32
    return %c0_i32, %arg0 : i32, i32
  }
}

</mosaic_0001>

<bundles_post_ra>
// kernel: tpu_custom_call.1
= control target key start
LH: loop header
LB: loop body
LE: loop exit
PB: predicated region body
PF: predicated region fallthrough
CT: control target
= control target key end

     0   :  { %s2774_s0 = inlined_call_operand.hbm [shape: f32[49,2304], index: 0, kind: input, shape index: {}]   ;;  %s2775_s1 = inlined_call_operand.hbm [shape: f32[1,2304], index: 1, kind: input, shape index: {}]   ;;  %s2776_s2 = inlined_call_operand.hbm [shape: f32[1,2304], index: 2, kind: input, shape index: {}]   ;;  %s2777_s3 = inlined_call_operand.hbm [shape: f32[49,2304], index: 3, kind: output, shape index: {}]  }
   0x1   :  { %2894 = sst [smem:[#allocation76_spill]] %s2774_s0 }
   0x2   :  { %2895 = sst [smem:[#allocation77_spill]] %s2775_s1 }
   0x3   :  { %8 = vsyncpa [#allocation3], 0 }
   0x4   :  { %10 = vsyncpa [#allocation3 + $0x1], 0 }
   0x5   :  { %11 = vsyncpa [#allocation6], 0 }
   0x6   :  { %13 = vsyncpa [#allocation6 + $0x1], 0 }
   0x7   :  { %14 = vsyncpa [#allocation4], 0 }
   0x8   :  { %16 = vsyncpa [#allocation4 + $0x1], 0  ;;  %s1580_s12 = smov 0   ;;  %s1582_s13 = smov 0  }
   0x9   :  { %s1584_s14 = smov 0   ;;  %s1586_s15 = smov 0  }
   0xa LB: > { %s1601_s16 = sadd.s32 4294967295, %s1547_s15   ;;  %s1273_s17 = sadd.s32 4294967294, %s1547_s15   ;;  %s1547_s15 = sphi %s1586_s15, %s3124_s15   ;;  %s1543_s14 = sphi %s1584_s14, %s3123_s14   ;;  %s1539_s13 = sphi %s1582_s13, %s3122_s13   ;;  %s1535_s12 = sphi %s1580_s12, %s3121_s12  }
   0xb   : > { %s1605_s18 = sadd.s32 1, %s1547_s15   ;;  %s29_s19 = sadd.s32 1, %s1543_s14 }
   0xc   : > { %s26_s20 = ssub.s32 %s1547_s15, %s1605_s18  ;;  %p36_p0 = scmp.ne.s32.totalorder %s1543_s14, %s1539_s13 }
   0xd   : > { %p27_p1 = scmp.eq.s32.totalorder %s26_s20, 0  ;;  %p37_p2 = scmp.eq.s32.totalorder %s1547_s15, 0 }
   0xe   : > { %p42_p3 = scmp.ne.s32.totalorder %s1539_s13, %s1535_s12  ;;  %p43_p4 = scmp.eq.s32.totalorder %s1601_s16, 0 }
   0xf   : > { %s1617_s21 = scalar_select %p27_p1, %s1543_s14, %s29_s19  }
  0x10   : > { %p38_p5 = por %p37_p2, %p36_p0  ;;  %p1619_p6 = por %p43_p4, %p42_p3 }
  0x11   : > { %p118_p7 = scmp.eq.s32.totalorder %s1601_s16, 1  ;;  %p124_p8 = scmp.eq.s32.totalorder %s1273_s17, 1 }
  0x12   : > { %s2896_s22 = scalar_select %p1619_p6, 1, 0 }
  0x13   : > { %p1315_p10 = scmp.lt.s32.totalorder %s1547_s15, 2  ;;  %p1626_p11 = por %p118_p7, %p36_p0 }
  0x14   : > { %p1630_p12 = por %p124_p8, %p42_p3  ;;  %s1635_s25 = sand.u32 1, %s1543_s14  }
  0x15   : > { %s2897_s23 = scalar_select %p1626_p11, 1, 0 }
  0x16   : > { %s2898_s24 = scalar_select %p1630_p12, 1, 0 }
  0x17   : > { %p1637_p13 = pnand %p1315_p10, %p38_p5  ;;  %s1288_s27 = smul.u32 504, %s1635_s25 }
  0x18   : > { %s165_s28 = sand.u32 1, %s1547_s15   ;;  %s2780_s4 = smul.u32 9, %s1635_s25 }
  0x19   : > { %s2899_s26 = scalar_select %p1637_p13, 1, 0 }
  0x1a   : > { %s148_s29 = scalar_lea.vmem [#allocation2], %s1288_s27  ;;  %s2781_s5 = smul.u32 144, %s1547_s15 }
  0x1b   : > { %s155_s30 = sshll.u32 %s148_s29, 4  ;;  %s2900_s1 = sld [smem:[#allocation77_spill]]  ;;  %s1644_s30 = int_to_ptr.vmem [resolvable:$true] %s155_s30 }
  0x1c   : > { %s169_s9 = scalar_lea.vmem [#allocation5], %s2780_s4  ;;  %s1660_s11 = scalar_lea.sflag [#allocation6], %s165_s28 }
  0x1d   : > { %s177_s10 = sshll.u32 %s169_s9, 4  ;;  %p1666_p3 = pneg %p1637_p13  ;;  %s1657_s10 = int_to_ptr.vmem [resolvable:$true] %s177_s10 }
  0x21   : > { %s1653_s8 = scalar_lea.hbm %s2900_s1, %s2781_s5  ;;  %s1392_s29 = scalar_lea.hbm %s2900_s1, 288 }
  0x22   : > { %s1387_s17 = scalar_lea.hbm %s1653_s8, 144  ;;  %p1393_p7 = scmp.lt.u32.totalorder %s1653_s8, %s2900_s1 }
  0x23   : > { %p1388_p2 = scmp.ne.s32.totalorder %s1653_s8, %s1387_s17  ;;  %p1394_p8 = scmp.lt.u32.totalorder %s1392_s29, %s1387_s17 }
  0x24   : > { %p1396_p9 = scmp.lt.u32.totalorder %s1387_s17, %s1653_s8 }
  0x25   : > { %p1390_p4 = pnand %p1666_p3, %p1388_p2  ;;  %p1395_p10 = por %p1394_p8, %p1393_p7 }
  0x27   : > { %p1391_p5 = pneg %p1390_p4  ;;  %p1397_p0 = por %p1396_p9, %p1395_p10 }
  0x29   : > { %p1398_p1 = pnand %p1397_p0, %p1391_p5 }
  0x2b   : > { %1401 = shalt.err (!%p1398_p1)
}
  0x2c   : > { %s1402_s28 = scalar_lea.vmem %s1657_s10, 144  ;;  %s1549_s9 = smov [#allocation5]  }
  0x2d   : > { %p1403_p2 = scmp.ne.s32.totalorder %s1657_s10, %s1402_s28  ;;  %s1407_s20 = sshll.u32 %s1549_s9, 4  ;;  %s1408_s20 = int_to_ptr.vmem [resolvable:$false] %s1407_s20 }
  0x2e   : > { %s1409_s27 = scalar_lea.vmem %s1408_s20, 288  ;;  %p1410_p11 = scmp.lt.s32.totalorder %s1657_s10, %s1408_s20 }
  0x2f   : > { %p1405_p4 = pnand %p1403_p2, %p1666_p3  ;;  %p1411_p6 = scmp.lt.s32.totalorder %s1409_s27, %s1402_s28 }
  0x31   : > { %p1406_p12 = pneg %p1405_p4  ;;  %p1412_p7 = por %p1411_p6, %p1410_p11 }
  0x33   : > { %p1413_p8 = pnand %p1412_p7, %p1406_p12 }
  0x35   : > { %1416 = shalt.err (!%p1413_p8)
}
  0x36   : > { %1307 = dma.hbm_to_vmem [thread:$0]  (!%p1637_p13), %s1653_s8, 144, %s1657_s10, %s1660_s11  }
  0x37   : > { %p2902_p9 = scmp.lt.s32.totalorder %s1547_s15, 3  ;;  %p2903_p0 = scmp.ge.s32.totalorder %s1547_s15, 1 }
  0x38   : > { %s1284_s29 = smul.u32 1152, %s1547_s15  ;;  %s2905_s0 = sld [smem:[#allocation76_spill]] }
  0x39   : > { %p1694_p1 = pnand %p2903_p0, %p2902_p9  ;;  %s145_s9 = scalar_lea.sflag [#allocation3], %s1635_s25 }
  0x3b   : > { %s2904_s17 = scalar_select %p1694_p1, 1, 0 }
  0x3e   : > { %s1702_s28 = scalar_lea.hbm %s2905_s0, %s1284_s29  ;;  %s1422_s27 = scalar_lea.hbm %s2905_s0, 16128 }
  0x3f   : > { %s1417_s20 = scalar_lea.hbm %s1702_s28, 8064  ;;  %p1423_p5 = scmp.lt.u32.totalorder %s1702_s28, %s2905_s0 }
  0x40   : > { %p1418_p6 = scmp.ne.s32.totalorder %s1702_s28, %s1417_s20  ;;  %p1424_p10 = scmp.lt.u32.totalorder %s1422_s27, %s1417_s20 }
  0x41   : > { %p1426_p4 = scmp.lt.u32.totalorder %s1417_s20, %s1702_s28 }
  0x42   : > { %p1420_p11 = pnand %p1418_p6, %p1666_p3  ;;  %p1425_p2 = por %p1424_p10, %p1423_p5 }
  0x44   : > { %p1421_p12 = pneg %p1420_p11  ;;  %p1427_p7 = por %p1426_p4, %p1425_p2 }
  0x46   : > { %p1428_p8 = pnand %p1427_p7, %p1421_p12 }
  0x48   : > { %1431 = shalt.err (!%p1428_p8)
}
  0x49   : > { %s1432_s29 = scalar_lea.vmem %s1644_s30, 8064  ;;  %s1550_s6 = smov [#allocation2]  }
  0x4a   : > { %p1433_p9 = scmp.ne.s32.totalorder %s1644_s30, %s1432_s29  ;;  %s1437_s7 = sshll.u32 %s1550_s6, 4  ;;  %s1438_s7 = int_to_ptr.vmem [resolvable:$false] %s1437_s7 }
  0x4b   : > { %s1439_s4 = scalar_lea.vmem %s1438_s7, 16128  ;;  %p1440_p11 = scmp.lt.s32.totalorder %s1644_s30, %s1438_s7 }
  0x4c   : > { %p1435_p0 = pnand %p1433_p9, %p1666_p3  ;;  %p1441_p1 = scmp.lt.s32.totalorder %s1439_s4, %s1432_s29 }
  0x4e   : > { %p1436_p6 = pneg %p1435_p0  ;;  %p1442_p5 = por %p1441_p1, %p1440_p11 }
  0x50   : > { %p1443_p10 = pnand %p1442_p5, %p1436_p6 }
  0x52   : > { %1446 = shalt.err (!%p1443_p10)
}
  0x53   : > { %s1551_s5 = smov 2304   ;;  %s1552_s20 = smov 1152  }
  0x54   : > { %s1553_s8 = smov 72   ;;  %s2906_s10 = smul.u32 144, %s1547_s15 }
  0x55   : > { %1304 = dma.hbm_to_vmem [thread:$0]  (!%p1637_p13), %s1702_s28, 8064, %s1644_s30, %s145_s9, %s1551_s5, %s1552_s20, %s1553_s8  }
  0x56   : > { %s1733_s29 = scalar_lea.hbm %s2776_s2, %s2906_s10  ;;  %s2907_s7 = smul.u32 9, %s1635_s25 }
  0x57   : > { %s1447_s1 = scalar_lea.hbm %s1733_s29, 144  ;;  %s1452_s9 = scalar_lea.hbm %s2776_s2, 288 }
  0x58   : > { %s188_s4 = scalar_lea.vmem [#allocation7], %s2907_s7  ;;  %p1448_p1 = scmp.ne.s32.totalorder %s1733_s29, %s1447_s1 }
  0x59   : > { %s196_s0 = sshll.u32 %s188_s4, 4  ;;  %p1453_p4 = scmp.lt.u32.totalorder %s1733_s29, %s2776_s2  ;;  %s197_s0 = int_to_ptr.vmem [resolvable:$true] %s196_s0 }
  0x5a   : > { %p1450_p12 = pnand %p1448_p1, %p1666_p3  ;;  %p1454_p7 = scmp.lt.u32.totalorder %s1452_s9, %s1447_s1 }
  0x5b   : > { %p1456_p9 = scmp.lt.u32.totalorder %s1447_s1, %s1733_s29 }
  0x5c   : > { %p1451_p2 = pneg %p1450_p12  ;;  %p1455_p8 = por %p1454_p7, %p1453_p4 }
  0x5e   : > { %p1457_p0 = por %p1456_p9, %p1455_p8 }
  0x60   : > { %p1458_p6 = pnand %p1457_p0, %p1451_p2 }
  0x62   : > { %1461 = shalt.err (!%p1458_p6)
}
  0x63   : > { %s1462_s25 = scalar_lea.vmem %s197_s0, 144  ;;  %s1554_s8 = smov [#allocation7]  }
  0x64   : > { %p1463_p11 = scmp.ne.s32.totalorder %s197_s0, %s1462_s25  ;;  %s1467_s10 = sshll.u32 %s1554_s8, 4  ;;  %s1468_s10 = int_to_ptr.vmem [resolvable:$false] %s1467_s10 }
  0x65   : > { %s1469_s27 = scalar_lea.vmem %s1468_s10, 288  ;;  %p1470_p1 = scmp.lt.s32.totalorder %s197_s0, %s1468_s10 }
  0x66   : > { %p1465_p5 = pnand %p1463_p11, %p1666_p3  ;;  %p1471_p12 = scmp.lt.s32.totalorder %s1469_s27, %s1462_s25 }
  0x68   : > { %p1466_p10 = pneg %p1465_p5  ;;  %p1472_p13 = por %p1471_p12, %p1470_p1 }
  0x6a   : > { %p1473_p4 = pnand %p1472_p13, %p1466_p10 }
  0x6c   : > { %1476 = shalt.err (!%p1473_p4)
}
  0x6d   : > { %p2908_p7 = scmp.ne.s32.totalorder %s2899_s26, 0  ;;  %p2909_p2 = scmp.ne.s32.totalorder %s2904_s17, 0 }
  0x6f   : > { %1310 = dma.hbm_to_vmem [thread:$0]  (!%p2908_p7), %s1733_s29, 144, %s197_s0, %s1660_s11  }
  0x70   : > { %205 = sbr.rel (%p2909_p2) target bundleno = 354 (0x162), region = 32 }
  0x77   : > { %s1758_s1 = sand.u32 1, %s1539_s13   ;;  %p2910_p13 = scmp.ne.s32.totalorder %s2896_s22, 0 }
  0x78   : > { %s1291_s19 = smul.u32 504, %s1758_s1  ;;  %s208_s6 = scalar_lea.sflag [#allocation3], %s1758_s1 }
  0x7a   : > { %s1764_s7 = scalar_lea.vmem [#allocation2], %s1291_s19 }
  0x7b   : > { %1522 = dma.done.wait (%p2910_p13), %s208_s6, 8064  }
  0x7c   : > { %1524 = vsyncadd (%p2910_p13), %s208_s6, 4294959232  ;;  %s216_s0 = sand.u32 1, %s1601_s16   ;;  %s1292_s26 = smul.u32 9, %s1758_s1 }
  0x7d   : > { %s217_s11 = scalar_lea.sflag [#allocation6], %s216_s0 }
  0x7e   : > { %s1774_s17 = scalar_lea.vmem [#allocation5], %s1292_s26 }
  0x7f   : > { %1526 = dma.done.wait (%p2910_p13), %s217_s11, 288  }
  0x80   : > { %1528 = vsyncadd (%p2910_p13), %s217_s11, 4294967008  ;;  %v1781_v0 = vld [vmem:[%s1764_s7] sm:$0xff]  ;;  %v1784_v1 = vld [vmem:[%s1764_s7 + $0x8] sm:$0xff]  ;;  %vm334_vm0 = vcmask 1040384   ;;  %s2415_s22 = scalar_lea.vmem [#allocation7], %s1292_s26  ;;  %s2525_s29 = scalar_lea.vmem [#allocation8], %s1291_s19 }
  0x81   : > { %2911 = vst [vmem:[#allocation12_spill] sm:$0xff] %v1781_v0  ;;  %2912 = vst [vmem:[#allocation13_spill] sm:$0xff] %v1784_v1  ;;  %v1787_v2 = vld [vmem:[%s1764_s7 + $0x10] sm:$0xff]  ;;  %v1790_v3 = vld [vmem:[%s1764_s7 + $0x18] sm:$0xff]  ;;  %s1287_s4 = smul.u32 1152, %s1601_s16  ;;  %s1157_s30 = sshll.u32 %s2525_s29, 4  ;;  %s2723_s30 = int_to_ptr.vmem [resolvable:$true] %s1157_s30 }
  0x82   : > { %2913 = vst [vmem:[#allocation14_spill] sm:$0xff] %v1787_v2  ;;  %2914 = vst [vmem:[#allocation15_spill] sm:$0xff] %v1790_v3  ;;  %v1793_v4 = vld [vmem:[%s1764_s7 + $0x20] sm:$0xff]  ;;  %v1796_v5 = vld [vmem:[%s1764_s7 + $0x28] sm:$0xff]  ;;  %s1144_s5 = scalar_lea.sflag [#allocation4], %s1758_s1  ;;  %s1477_s20 = scalar_lea.vmem %s2723_s30, 8064 }
  0x83   : > { %2915 = vst [vmem:[#allocation16_spill] sm:$0xff] %v1793_v4  ;;  %2916 = vst [vmem:[#allocation17_spill] sm:$0xff] %v1796_v5  ;;  %v1799_v6 = vld [vmem:[%s1764_s7 + $0x30] sm:$0xff]  ;;  %v1802_v7 = vld [vmem:[%s1764_s7 + $0x38] sm:$0xff]  ;;  %s2721_s9 = scalar_lea.hbm %s2777_s3, %s1287_s4  ;;  %p1478_p3 = scmp.ne.s32.totalorder %s2723_s30, %s1477_s20 }
  0x84   : > { %2917 = vst [vmem:[#allocation18_spill] sm:$0xff] %v1799_v6  ;;  %2918 = vst [vmem:[#allocation19_spill] sm:$0xff] %v1802_v7  ;;  %v1805_v8 = vld [vmem:[%s1764_s7 + $0x48] sm:$0xff]  ;;  %v1808_v9 = vld [vmem:[%s1764_s7 + $0x50] sm:$0xff]  ;;  %p3118_p8 = scmp.ne.s32.totalorder %s2897_s23, 0  ;;  %s1556_s25 = smov [#allocation8]  }
  0x85   : > { %2919 = vst [vmem:[#allocation20_spill] sm:$0xff] %v1805_v8  ;;  %2920 = vst [vmem:[#allocation21_spill] sm:$0xff] %v1808_v9  ;;  %v1811_v10 = vld [vmem:[%s1764_s7 + $0x58] sm:$0xff]  ;;  %v1814_v11 = vld [vmem:[%s1764_s7 + $0x60] sm:$0xff]  ;;  %v329_v12 = vadd.f32 %v1805_v8, %v1781_v0  ;;  %v343_v16 = vadd.f32 %v1808_v9, %v1784_v1  ;;  %s1481_s8 = sshll.u32 %s1556_s25, 4  ;;  %s1482_s8 = int_to_ptr.vmem [resolvable:$false] %s1481_s8 }
  0x86   : > { %2921 = vst [vmem:[#allocation22_spill] sm:$0xff] %v1811_v10  ;;  %2922 = vst [vmem:[#allocation23_spill] sm:$0xff] %v1814_v11  ;;  %v1819_v13 = vld [vmem:[%s1764_s7 + $0x68] sm:$0xff]  ;;  %v1822_v14 = vld [vmem:[%s1764_s7 + $0x70] sm:$0xff]  ;;  %v356_v17 = vadd.f32 %v1811_v10, %v1787_v2  ;;  %v369_v18 = vadd.f32 %v1814_v11, %v1790_v3  ;;  %p1479_p9 = pnand %p1478_p3, %p3118_p8  ;;  %s1483_s10 = scalar_lea.vmem %s1482_s8, 16128 }
  0x87   : > { %2923 = vst [vmem:[#allocation24_spill] sm:$0xff] %v1819_v13  ;;  %2924 = vst [vmem:[#allocation25_spill] sm:$0xff] %v1822_v14  ;;  %v1825_v15 = vld [vmem:[%s1764_s7 + $0x78] sm:$0xff]  ;;  %v1834_v19 = vld [vmem:[%s1764_s7 + $0x80] sm:$0xff]  ;;  %v382_v22 = vadd.f32 %v1819_v13, %v1793_v4  ;;  %v395_v23 = vadd.f32 %v1822_v14, %v1796_v5  ;;  %p1484_p6 = scmp.lt.s32.totalorder %s2723_s30, %s1482_s8  ;;  %p1485_p11 = scmp.lt.s32.totalorder %s1483_s10, %s1477_s20 }
  0x88   : > { %2925 = vst [vmem:[#allocation26_spill] sm:$0xff] %v1825_v15  ;;  %2926 = vst [vmem:[#allocation27_spill] sm:$0xff] %v1834_v19  ;;  %v1837_v20 = vld [vmem:[%s1764_s7 + $0x90] sm:$0xff]  ;;  %v1840_v21 = vld [vmem:[%s1764_s7 + $0x98] sm:$0xff]  ;;  %v408_v24 = vadd.f32 %v1825_v15, %v1799_v6  ;;  %v421_v30 = vadd.f32 %v1834_v19, %v1802_v7  ;;  %p1480_p0 = pneg %p1479_p9 }
  0x89   : > { %2927 = vst [vmem:[#allocation28_spill] sm:$0xff] %v1837_v20  ;;  %2928 = vst [vmem:[#allocation29_spill] sm:$0xff] %v1840_v21  ;;  %v1849_v25 = vld [vmem:[%s1764_s7 + $0xa0] sm:$0xff]  ;;  %v1852_v26 = vld [vmem:[%s1764_s7 + $0xa8] sm:$0xff]  ;;  %v330_v28 = vadd.f32 %v329_v12, %v1837_v20  ;;  %v344_v29 = vadd.f32 %v343_v16, %v1840_v21  ;;  %p1486_p5 = por %p1485_p11, %p1484_p6 }
  0x8a   : > { %2929 = vst [vmem:[#allocation30_spill] sm:$0xff] %v1849_v25  ;;  %2930 = vst [vmem:[#allocation31_spill] sm:$0xff] %v1852_v26  ;;  %v1855_v27 = vld [vmem:[%s1764_s7 + $0xb0] sm:$0xff]  ;;  %v1862_v31 = vld [vmem:[%s1764_s7 + $0xb8] sm:$0xff]  ;;  %v357_v34 = vadd.f32 %v356_v17, %v1849_v25  ;;  %v370_v35 = vadd.f32 %v369_v18, %v1852_v26 }
  0x8b   : > { %2931 = vst [vmem:[#allocation32_spill] sm:$0xff] %v1855_v27  ;;  %2932 = vst [vmem:[#allocation33_spill] sm:$0xff] %v1862_v31  ;;  %v1865_v32 = vld [vmem:[%s1764_s7 + $0xc0] sm:$0xff]  ;;  %v1868_v33 = vld [vmem:[%s1764_s7 + $0xc8] sm:$0xff]  ;;  %v383_v36 = vadd.f32 %v382_v22, %v1855_v27  ;;  %v396_v40 = vadd.f32 %v395_v23, %v1862_v31  ;;  %p1487_p10 = pnand %p1486_p5, %p1480_p0 }
  0x8c   : > { %2933 = vst [vmem:[#allocation34_spill] sm:$0xff] %v1865_v32  ;;  %2934 = vst [vmem:[#allocation35_spill] sm:$0xff] %v1868_v33  ;;  %v1874_v37 = vld [vmem:[%s1764_s7 + $0xd8] sm:$0xff]  ;;  %v1877_v38 = vld [vmem:[%s1764_s7 + $0xe0] sm:$0xff]  ;;  %v409_v41 = vadd.f32 %v408_v24, %v1865_v32  ;;  %v422_v42 = vadd.f32 %v421_v30, %v1868_v33 }
  0x8d   : > { %2935 = vst [vmem:[#allocation36_spill] sm:$0xff] %v1874_v37  ;;  %2936 = vst [vmem:[#allocation37_spill] sm:$0xff] %v1877_v38  ;;  %v1880_v39 = vld [vmem:[%s1764_s7 + $0xe8] sm:$0xff]  ;;  %v1886_v43 = vld [vmem:[%s1764_s7 + $0xf0] sm:$0xff]  ;;  %v331_v46 = vadd.f32 %v330_v28, %v1874_v37  ;;  %v345_v47 = vadd.f32 %v344_v29, %v1877_v38 }
  0x8e   : > { %2937 = vst [vmem:[#allocation38_spill] sm:$0xff] %v1880_v39  ;;  %2938 = vst [vmem:[#allocation39_spill] sm:$0xff] %v1886_v43  ;;  %v1889_v44 = vld [vmem:[%s1764_s7 + $0xf8] sm:$0xff]  ;;  %v1892_v45 = vld [vmem:[%s1764_s7 + $0x100] sm:$0xff]  ;;  %v358_v48 = vadd.f32 %v357_v34, %v1880_v39  ;;  %v371_v52 = vadd.f32 %v370_v35, %v1886_v43 }
  0x8f   : > { %2939 = vst [vmem:[#allocation40_spill] sm:$0xff] %v1889_v44  ;;  %2940 = vst [vmem:[#allocation41_spill] sm:$0xff] %v1892_v45  ;;  %v1898_v49 = vld [vmem:[%s1764_s7 + $0x108] sm:$0xff]  ;;  %v1901_v50 = vld [vmem:[%s1764_s7 + $0x110] sm:$0xff]  ;;  %v384_v53 = vadd.f32 %v383_v36, %v1889_v44  ;;  %v397_v54 = vadd.f32 %v396_v40, %v1892_v45 }
  0x90   : > { %2941 = vst [vmem:[#allocation42_spill] sm:$0xff] %v1898_v49  ;;  %2942 = vst [vmem:[#allocation43_spill] sm:$0xff] %v1901_v50  ;;  %v1904_v51 = vld [vmem:[%s1764_s7 + $0x120] sm:$0xff]  ;;  %v1910_v55 = vld [vmem:[%s1764_s7 + $0x128] sm:$0xff]  ;;  %v410_v59 = vadd.f32 %v409_v41, %v1898_v49  ;;  %v423_v60 = vadd.f32 %v422_v42, %v1901_v50 }
  0x91   : > { %2943 = vst [vmem:[#allocation44_spill] sm:$0xff] %v1904_v51  ;;  %2944 = vst [vmem:[#allocation45_spill] sm:$0xff] %v1910_v55  ;;  %v1913_v56 = vld [vmem:[%s1764_s7 + $0x130] sm:$0xff]  ;;  %v1916_v57 = vld [vmem:[%s1764_s7 + $0x138] sm:$0xff]  ;;  %v332_v58 = vadd.f32 %v331_v46, %v1904_v51  ;;  %v346_v12 = vadd.f32 %v345_v47, %v1910_v55 }
  0x92   : > { %2945 = vst [vmem:[#allocation46_spill] sm:$0xff] %v1913_v56  ;;  %2946 = vst [vmem:[#allocation47_spill] sm:$0xff] %v1916_v57  ;;  %v1922_v61 = vld [vmem:[%s1764_s7 + $0x140] sm:$0xff]  ;;  %v1925_v62 = vld [vmem:[%s1764_s7 + $0x148] sm:$0xff]  ;;  %v359_v16 = vadd.f32 %v358_v48, %v1913_v56  ;;  %v372_v17 = vadd.f32 %v371_v52, %v1916_v57 }
  0x93   : > { %2947 = vst [vmem:[#allocation48_spill] sm:$0xff] %v1922_v61  ;;  %2948 = vst [vmem:[#allocation49_spill] sm:$0xff] %v1925_v62  ;;  %v1928_v63 = vld [vmem:[%s1764_s7 + $0x150] sm:$0xff]  ;;  %v1934_v18 = vld [vmem:[%s1764_s7 + $0x158] sm:$0xff]  ;;  %v385_v24 = vadd.f32 %v384_v53, %v1922_v61  ;;  %v398_v28 = vadd.f32 %v397_v54, %v1925_v62 }
  0x94   : > { %2949 = vst [vmem:[#allocation50_spill] sm:$0xff] %v1928_v63  ;;  %2950 = vst [vmem:[#allocation51_spill] sm:$0xff] %v1934_v18  ;;  %v1937_v22 = vld [vmem:[%s1764_s7 + $0x168] sm:$0xff]  ;;  %v1940_v23 = vld [vmem:[%s1764_s7 + $0x170] sm:$0xff]  ;;  %v411_v35 = vadd.f32 %v410_v59, %v1928_v63  ;;  %v424_v36 = vadd.f32 %v423_v60, %v1934_v18 }
  0x95   : > { %2951 = vst [vmem:[#allocation52_spill] sm:$0xff] %v1937_v22  ;;  %2952 = vst [vmem:[#allocation53_spill] sm:$0xff] %v1940_v23  ;;  %v1945_v29 = vld [vmem:[%s1764_s7 + $0x178] sm:$0xff]  ;;  %v1948_v30 = vld [vmem:[%s1764_s7 + $0x180] sm:$0xff]  ;;  %v333_v46 = vadd.f32 %v332_v58, %v1937_v22  ;;  %v347_v47 = vadd.f32 %v346_v12, %v1940_v23 }
  0x96   : > { %2953 = vst [vmem:[#allocation54_spill] sm:$0xff] %v1945_v29  ;;  %2954 = vst [vmem:[#allocation55_spill] sm:$0xff] %v1948_v30  ;;  %v1951_v34 = vld [vmem:[%s1764_s7 + $0x188] sm:$0xff]  ;;  %v1956_v40 = vld [vmem:[%s1764_s7 + $0x190] sm:$0xff]  ;;  %v360_v54 = vadd.f32 %v359_v16, %v1945_v29  ;;  %v373_v59 = vadd.f32 %v372_v17, %v1948_v30 }
  0x97   : > { %2955 = vst [vmem:[#allocation56_spill] sm:$0xff] %v1951_v34  ;;  %2956 = vst [vmem:[#allocation57_spill] sm:$0xff] %v1956_v40  ;;  %v1959_v41 = vld [vmem:[%s1764_s7 + $0x198] sm:$0xff]  ;;  %v1962_v42 = vld [vmem:[%s1764_s7 + $0x1a0] sm:$0xff]  ;;  %v386_v12 = vadd.f32 %v385_v24, %v1951_v34  ;;  %v399_v23 = vadd.f32 %v398_v28, %v1956_v40 }
  0x98   : > { %2957 = vst [vmem:[#allocation58_spill] sm:$0xff] %v1959_v41  ;;  %2958 = vst [vmem:[#allocation59_spill] sm:$0xff] %v1962_v42  ;;  %v1967_v48 = vld [vmem:[%s1764_s7 + $0x1b0] sm:$0x1]  ;;  %v1970_v52 = vld [vmem:[%s1764_s7 + $0x1b8] sm:$0x1]  ;;  %v412_v16 = vadd.f32 %v411_v35, %v1959_v41  ;;  %v425_v17 = vadd.f32 %v424_v36, %v1962_v42 }
  0x99   : > { %2959 = vst [vmem:[#allocation60_spill] sm:$0xff] %v1967_v48  ;;  %2960 = vst [vmem:[#allocation61_spill] sm:$0xff] %v1970_v52  ;;  %v1973_v53 = vld [vmem:[%s1764_s7 + $0x1c0] sm:$0x1]  ;;  %v1978_v60 = vld [vmem:[%s1764_s7 + $0x1c8] sm:$0x1] }
  0x9a   : > { %2961 = vst [vmem:[#allocation62_spill] sm:$0xff] %v1973_v53  ;;  %2962 = vst [vmem:[#allocation63_spill] sm:$0xff] %v1978_v60  ;;  %v1981_v18 = vld [vmem:[%s1764_s7 + $0x1d0] sm:$0x1]  ;;  %v1984_v58 = vld [vmem:[%s1764_s7 + $0x1d8] sm:$0x1] }
  0x9b   : > { %2963 = vst [vmem:[#allocation64_spill] sm:$0xff] %v1981_v18  ;;  %2964 = vst [vmem:[#allocation65_spill] sm:$0xff] %v1984_v58  ;;  %v335_v63 = vsel %vm334_vm0, %v1967_v48, 0.0  ;;  %v348_v62 = vsel %vm334_vm0, %v1970_v52, 0.0  ;;  %v1995_v30 = vld [vmem:[%s1764_s7 + $0x1e0] sm:$0x1] }
  0x9c   : > { %2965 = vst [vmem:[#allocation66_spill] sm:$0xff] %v1995_v30  ;;  %v1998_v29 = vld [vmem:[%s1764_s7 + $0x1e8] sm:$0x1]  ;;  %v336_v61 = vadd.f32 %v335_v63, %v333_v46  ;;  %v349_v57 = vadd.f32 %v348_v62, %v347_v47  ;;  %v361_v24 = vsel %vm334_vm0, %v1973_v53, 0.0  ;;  %v374_v28 = vsel %vm334_vm0, %v1978_v60, 0.0 }
  0x9d   : > { %2966 = vst [vmem:[#allocation67_spill] sm:$0xff] %v1998_v29  ;;  %v362_v22 = vadd.f32 %v361_v24, %v360_v54  ;;  %v375_v48 = vadd.f32 %v374_v28, %v373_v59  ;;  %v387_v52 = vsel %vm334_vm0, %v1981_v18, 0.0  ;;  %v400_v35 = vsel %vm334_vm0, %v1984_v58, 0.0 }
  0x9e   : > { %v337_v36 = vrot.slane %v336_v61, 4  ;;  %v350_v42 = vrot.slane %v349_v57, 4  ;;  %v388_v41 = vadd.f32 %v387_v52, %v386_v12  ;;  %v401_v40 = vadd.f32 %v400_v35, %v399_v23 }
  0x9f   : > { %v363_v63 = vrot.slane %v362_v22, 4  ;;  %v376_v62 = vrot.slane %v375_v48, 4  ;;  %v413_v46 = vsel %vm334_vm0, %v1995_v30, 0.0  ;;  %v426_v47 = vsel %vm334_vm0, %v1998_v29, 0.0 }
  0xa0   : > { %v338_v54 = vadd.f32 %v337_v36, %v336_v61  ;;  %v351_v59 = vadd.f32 %v350_v42, %v349_v57  ;;  %v389_v24 = vrot.slane %v388_v41, 4  ;;  %v402_v28 = vrot.slane %v401_v40, 4 }
  0xa1   : > { %v364_v18 = vadd.f32 %v363_v63, %v362_v22  ;;  %v377_v60 = vadd.f32 %v376_v62, %v375_v48  ;;  %v414_v53 = vadd.f32 %v413_v46, %v412_v16  ;;  %v427_v58 = vadd.f32 %v426_v47, %v425_v17 }
  0xa2   : > { %v339_v34 = vrot.slane %v338_v54, 2  ;;  %v352_v56 = vrot.slane %v351_v59, 2  ;;  %v390_v52 = vadd.f32 %v389_v24, %v388_v41  ;;  %v403_v23 = vadd.f32 %v402_v28, %v401_v40 }
  0xa3   : > { %v365_v12 = vrot.slane %v364_v18, 2  ;;  %v378_v35 = vrot.slane %v377_v60, 2  ;;  %v415_v55 = vrot.slane %v414_v53, 4  ;;  %v428_v51 = vrot.slane %v427_v58, 4 }
  0xa4   : > { %v340_v30 = vadd.f32 %v339_v34, %v338_v54  ;;  %v353_v50 = vadd.f32 %v352_v56, %v351_v59  ;;  %v391_v49 = vrot.slane %v390_v52, 2  ;;  %v404_v29 = vrot.slane %v403_v23, 2 }
  0xa5   : > { %v366_v61 = vadd.f32 %v365_v12, %v364_v18  ;;  %v379_v57 = vadd.f32 %v378_v35, %v377_v60  ;;  %v416_v42 = vadd.f32 %v415_v55, %v414_v53  ;;  %v429_v36 = vadd.f32 %v428_v51, %v427_v58 }
  0xa6   : > { %v341_v22 = vrot.slane %v340_v30, 1  ;;  %v354_v48 = vrot.slane %v353_v50, 1  ;;  %v392_v16 = vadd.f32 %v391_v49, %v390_v52  ;;  %v405_v17 = vadd.f32 %v404_v29, %v403_v23 }
  0xa7   : > { %v367_v63 = vrot.slane %v366_v61, 1  ;;  %v380_v62 = vrot.slane %v379_v57, 1  ;;  %v417_v41 = vrot.slane %v416_v42, 2  ;;  %v430_v40 = vrot.slane %v429_v36, 2 }
  0xa8   : > { %v342_v46 = vadd.f32 %v341_v22, %v340_v30  ;;  %v355_v47 = vadd.f32 %v354_v48, %v353_v50  ;;  %v393_v24 = vrot.slane %v392_v16, 1  ;;  %v406_v28 = vrot.slane %v405_v17, 1 }
  0xa9   : > { %v368_v34 = vadd.f32 %v367_v63, %v366_v61  ;;  %v381_v56 = vadd.f32 %v380_v62, %v379_v57  ;;  %v418_v54 = vadd.f32 %v417_v41, %v416_v42  ;;  %v431_v59 = vadd.f32 %v430_v40, %v429_v36 }
  0xaa   : > { %v394_v18 = vadd.f32 %v393_v24, %v392_v16  ;;  %v407_v60 = vadd.f32 %v406_v28, %v405_v17  ;;  %v2012_v55 = vmul.f32 0.020408163, %v342_v46  ;;  %v2014_v51 = vmul.f32 0.020408163, %v355_v47 }
  0xab   : > { %v419_v49 = vrot.slane %v418_v54, 1  ;;  %v432_v29 = vrot.slane %v431_v59, 1  ;;  %v2016_v53 = vmul.f32 0.020408163, %v368_v34  ;;  %v2018_v58 = vmul.f32 0.020408163, %v381_v56 }
  0xac   : > { %2967 = vst [vmem:[#allocation68_spill] sm:$0xff] %v2012_v55  ;;  %2968 = vst [vmem:[#allocation69_spill] sm:$0xff] %v2014_v51  ;;  %v2020_v30 = vmul.f32 0.020408163, %v394_v18  ;;  %v2022_v50 = vmul.f32 0.020408163, %v407_v60  ;;  %v456_v52 = vsub.f32 %v1781_v0, %v2012_v55  ;;  %v457_v23 = vsub.f32 %v1784_v1, %v2014_v51 }
  0xad   : > { %2969 = vst [vmem:[#allocation70_spill] sm:$0xff] %v2016_v53  ;;  %2970 = vst [vmem:[#allocation71_spill] sm:$0xff] %v2018_v58  ;;  %v420_v12 = vadd.f32 %v419_v49, %v418_v54  ;;  %v433_v35 = vadd.f32 %v432_v29, %v431_v59  ;;  %v458_v61 = vsub.f32 %v1787_v2, %v2016_v53 }
  0xae   : > { %2971 = vst [vmem:[#allocation72_spill] sm:$0xff] %v2020_v30  ;;  %2972 = vst [vmem:[#allocation73_spill] sm:$0xff] %v2022_v50  ;;  %v459_v57 = vsub.f32 %v1790_v3, %v2018_v58  ;;  %v460_v42 = vsub.f32 %v1793_v4, %v2020_v30  ;;  %v461_v36 = vsub.f32 %v1796_v5, %v2022_v50 }
  0xaf   : > { %v465_v22 = vsub.f32 %v1805_v8, %v2012_v55  ;;  %v466_v48 = vsub.f32 %v1808_v9, %v2014_v51  ;;  %v2040_v16 = vmul.f32 0.020408163, %v420_v12  ;;  %v2042_v17 = vmul.f32 0.020408163, %v433_v35 }
  0xb0   : > { %v467_v63 = vsub.f32 %v1811_v10, %v2016_v53  ;;  %v468_v62 = vsub.f32 %v1814_v11, %v2018_v58  ;;  %v469_v41 = vsub.f32 %v1819_v13, %v2020_v30  ;;  %v470_v40 = vsub.f32 %v1822_v14, %v2022_v50 }
  0xb1   : > { %2973 = vst [vmem:[#allocation74_spill] sm:$0xff] %v2040_v16  ;;  %2974 = vst [vmem:[#allocation75_spill] sm:$0xff] %v2042_v17  ;;  %v474_v46 = vsub.f32 %v1837_v20, %v2012_v55  ;;  %v475_v47 = vsub.f32 %v1840_v21, %v2014_v51  ;;  %v462_v24 = vsub.f32 %v1799_v6, %v2040_v16 }
  0xb2   : > { %v463_v28 = vsub.f32 %v1802_v7, %v2042_v17  ;;  %v471_v34 = vsub.f32 %v1825_v15, %v2040_v16  ;;  %v472_v56 = vsub.f32 %v1834_v19, %v2042_v17  ;;  %v476_v54 = vsub.f32 %v1849_v25, %v2016_v53 }
  0xb3   : > { %v477_v59 = vsub.f32 %v1852_v26, %v2018_v58  ;;  %v478_v18 = vsub.f32 %v1855_v27, %v2020_v30  ;;  %v479_v60 = vsub.f32 %v1862_v31, %v2022_v50  ;;  %v480_v49 = vsub.f32 %v1865_v32, %v2040_v16 }
  0xb4   : > { %v481_v29 = vsub.f32 %v1868_v33, %v2042_v17  ;;  %v483_v12 = vsub.f32 %v1874_v37, %v2012_v55  ;;  %v484_v35 = vsub.f32 %v1877_v38, %v2014_v51  ;;  %v485_v26 = vsub.f32 %v1880_v39, %v2016_v53  ;;  %v2975_v33 = vld [vmem:[#allocation42_spill] sm:$0xff]  ;;  %v2976_v37 = vld [vmem:[#allocation43_spill] sm:$0xff]  ;;  %v2977_v38 = vld [vmem:[#allocation44_spill] sm:$0xff] }
  0xb5   : > { %v486_v27 = vsub.f32 %v1886_v43, %v2018_v58  ;;  %v487_v31 = vsub.f32 %v1889_v44, %v2020_v30  ;;  %v488_v32 = vsub.f32 %v1892_v45, %v2022_v50  ;;  %v489_v25 = vsub.f32 %v2975_v33, %v2040_v16  ;;  %v2978_v39 = vld [vmem:[#allocation45_spill] sm:$0xff]  ;;  %v2979_v43 = vld [vmem:[#allocation46_spill] sm:$0xff]  ;;  %v2980_v44 = vld [vmem:[#allocation47_spill] sm:$0xff] }
  0xb6   : > { %v490_v21 = vsub.f32 %v2976_v37, %v2042_v17  ;;  %v492_v20 = vsub.f32 %v2977_v38, %v2012_v55  ;;  %v493_v19 = vsub.f32 %v2978_v39, %v2014_v51  ;;  %v494_v15 = vsub.f32 %v2979_v43, %v2016_v53  ;;  %v2981_v45 = vld [vmem:[#allocation48_spill] sm:$0xff]  ;;  %v2982_v33 = vld [vmem:[#allocation49_spill] sm:$0xff]  ;;  %v2983_v37 = vld [vmem:[#allocation50_spill] sm:$0xff] }
  0xb7   : > { %v495_v14 = vsub.f32 %v2980_v44, %v2018_v58  ;;  %v496_v13 = vsub.f32 %v2981_v45, %v2020_v30  ;;  %v497_v7 = vsub.f32 %v2982_v33, %v2022_v50  ;;  %v498_v11 = vsub.f32 %v2983_v37, %v2040_v16  ;;  %v2984_v38 = vld [vmem:[#allocation51_spill] sm:$0xff]  ;;  %v2985_v39 = vld [vmem:[#allocation52_spill] sm:$0xff]  ;;  %v2986_v43 = vld [vmem:[#allocation53_spill] sm:$0xff] }
  0xb8   : > { %v499_v10 = vsub.f32 %v2984_v38, %v2042_v17  ;;  %v501_v9 = vsub.f32 %v2985_v39, %v2012_v55  ;;  %v502_v8 = vsub.f32 %v2986_v43, %v2014_v51  ;;  %v2987_v44 = vld [vmem:[#allocation54_spill] sm:$0xff]  ;;  %v2988_v45 = vld [vmem:[#allocation55_spill] sm:$0xff]  ;;  %v2989_v33 = vld [vmem:[#allocation56_spill] sm:$0xff] }
  0xb9   : > { %v503_v6 = vsub.f32 %v2987_v44, %v2016_v53  ;;  %v504_v5 = vsub.f32 %v2988_v45, %v2018_v58  ;;  %v505_v4 = vsub.f32 %v2989_v33, %v2020_v30  ;;  %v2990_v37 = vld [vmem:[#allocation57_spill] sm:$0xff]  ;;  %v2991_v38 = vld [vmem:[#allocation58_spill] sm:$0xff]  ;;  %v2992_v39 = vld [vmem:[#allocation59_spill] sm:$0xff] }
  0xba   : > { %v506_v3 = vsub.f32 %v2990_v37, %v2022_v50  ;;  %v507_v2 = vsub.f32 %v2991_v38, %v2040_v16  ;;  %v508_v1 = vsub.f32 %v2992_v39, %v2042_v17  ;;  %v2993_v43 = vld [vmem:[#allocation60_spill] sm:$0xff]  ;;  %v2994_v44 = vld [vmem:[#allocation61_spill] sm:$0xff]  ;;  %v2995_v45 = vld [vmem:[#allocation70_spill] sm:$0xff] }
  0xbb   : > { %v510_v0 = vsub.f32 %v2993_v43, %v2012_v55  ;;  %v511_v53 = vsub.f32 %v2994_v44, %v2014_v51  ;;  %v2996_v58 = vld [vmem:[#allocation62_spill] sm:$0xff]  ;;  %v2997_v33 = vld [vmem:[#allocation71_spill] sm:$0xff]  ;;  %v2999_v16 = vld [vmem:[#allocation72_spill] sm:$0xff] }
  0xbc   : > { %v512_v30 = vsub.f32 %v2996_v58, %v2995_v45  ;;  %v2998_v37 = vld [vmem:[#allocation63_spill] sm:$0xff]  ;;  %v3000_v38 = vld [vmem:[#allocation64_spill] sm:$0xff]  ;;  %v3001_v39 = vld [vmem:[#allocation73_spill] sm:$0xff] }
  0xbd   : > { %v513_v50 = vsub.f32 %v2998_v37, %v2997_v33  ;;  %v514_v17 = vsub.f32 %v3000_v38, %v2999_v16  ;;  %v3002_v43 = vld [vmem:[#allocation65_spill] sm:$0xff]  ;;  %v3003_v44 = vld [vmem:[#allocation74_spill] sm:$0xff]  ;;  %v3005_v58 = vld [vmem:[#allocation75_spill] sm:$0xff]  ;;  %v519_v16 = vmul.f32 %v456_v52, %v456_v52  ;;  %v520_v38 = vmul.f32 %v457_v23, %v457_v23 }
  0xbe   : > { %v515_v55 = vsub.f32 %v3002_v43, %v3001_v39  ;;  %v3004_v51 = vld [vmem:[#allocation66_spill] sm:$0xff]  ;;  %v3006_v33 = vld [vmem:[#allocation67_spill] sm:$0xff]  ;;  %v521_v39 = vmul.f32 %v458_v61, %v458_v61  ;;  %v522_v43 = vmul.f32 %v459_v57, %v459_v57  ;;  %v528_v52 = vmul.f32 %v465_v22, %v465_v22 }
  0xbf   : > { %v516_v45 = vsub.f32 %v3004_v51, %v3003_v44  ;;  %v517_v37 = vsub.f32 %v3006_v33, %v3005_v58  ;;  %v523_v44 = vmul.f32 %v460_v42, %v460_v42  ;;  %v2140_v51 = vmul.f32 %v461_v36, %v461_v36 }
  0xc0   : > { %v2142_v33 = vmul.f32 %v462_v24, %v462_v24  ;;  %v2144_v58 = vmul.f32 %v463_v28, %v463_v28  ;;  %v529_v23 = vmul.f32 %v466_v48, %v466_v48  ;;  %v530_v61 = vmul.f32 %v467_v63, %v467_v63 }
  0xc1   : > { %3007 = vst [vmem:[#allocation55_spill] sm:$0xff] %v2140_v51  ;;  %v531_v57 = vmul.f32 %v468_v62, %v468_v62  ;;  %v532_v42 = vmul.f32 %v469_v41, %v469_v41  ;;  %v533_v36 = vmul.f32 %v470_v40, %v470_v40  ;;  %v2146_v51 = vmul.f32 %v471_v34, %v471_v34 }
  0xc2   : > { %3008 = vst [vmem:[#allocation56_spill] sm:$0xff] %v2142_v33  ;;  %3009 = vst [vmem:[#allocation57_spill] sm:$0xff] %v2144_v58  ;;  %v2148_v24 = vmul.f32 %v472_v56, %v472_v56  ;;  %v537_v33 = vmul.f32 %v474_v46, %v474_v46  ;;  %v538_v28 = vmul.f32 %v475_v47, %v475_v47 }
  0xc3   : > { %3010 = vst [vmem:[#allocation58_spill] sm:$0xff] %v2146_v51  ;;  %v539_v58 = vmul.f32 %v476_v54, %v476_v54  ;;  %v540_v22 = vmul.f32 %v477_v59, %v477_v59  ;;  %v541_v48 = vmul.f32 %v478_v18, %v478_v18  ;;  %v542_v63 = vmul.f32 %v479_v60, %v479_v60 }
  0xc4   : > { %3011 = vst [vmem:[#allocation59_spill] sm:$0xff] %v2148_v24  ;;  %v2150_v62 = vmul.f32 %v480_v49, %v480_v49  ;;  %v2152_v41 = vmul.f32 %v481_v29, %v481_v29  ;;  %v546_v40 = vmul.f32 %v483_v12, %v483_v12  ;;  %v547_v34 = vmul.f32 %v484_v35, %v484_v35 }
  0xc5   : > { %v548_v51 = vmul.f32 %v485_v26, %v485_v26  ;;  %v549_v56 = vmul.f32 %v486_v27, %v486_v27  ;;  %v550_v24 = vmul.f32 %v487_v31, %v487_v31  ;;  %v551_v46 = vmul.f32 %v488_v32, %v488_v32 }
  0xc6   : > { %3012 = vst [vmem:[#allocation60_spill] sm:$0xff] %v2150_v62  ;;  %3013 = vst [vmem:[#allocation61_spill] sm:$0xff] %v2152_v41  ;;  %v2154_v47 = vmul.f32 %v489_v25, %v489_v25  ;;  %v2156_v54 = vmul.f32 %v490_v21, %v490_v21  ;;  %v555_v59 = vmul.f32 %v492_v20, %v492_v20 }
  0xc7   : > { %v556_v18 = vmul.f32 %v493_v19, %v493_v19  ;;  %v557_v60 = vmul.f32 %v494_v15, %v494_v15  ;;  %v558_v49 = vmul.f32 %v495_v14, %v495_v14  ;;  %v559_v62 = vmul.f32 %v496_v13, %v496_v13 }
  0xc8   : > { %3014 = vst [vmem:[#allocation62_spill] sm:$0xff] %v2154_v47  ;;  %3015 = vst [vmem:[#allocation63_spill] sm:$0xff] %v2156_v54  ;;  %v560_v29 = vmul.f32 %v497_v7, %v497_v7  ;;  %v2158_v41 = vmul.f32 %v498_v11, %v498_v11  ;;  %v2160_v12 = vmul.f32 %v499_v10, %v499_v10 }
  0xc9   : > { %v564_v35 = vmul.f32 %v501_v9, %v501_v9  ;;  %v565_v26 = vmul.f32 %v502_v8, %v502_v8  ;;  %v566_v27 = vmul.f32 %v503_v6, %v503_v6  ;;  %v567_v31 = vmul.f32 %v504_v5, %v504_v5 }
  0xca   : > { %v568_v32 = vmul.f32 %v505_v4, %v505_v4  ;;  %v569_v25 = vmul.f32 %v506_v3, %v506_v3  ;;  %v2162_v47 = vmul.f32 %v507_v2, %v507_v2  ;;  %v2164_v21 = vmul.f32 %v508_v1, %v508_v1 }
  0xcb   : > { %v573_v20 = vmul.f32 %v510_v0, %v510_v0  ;;  %v574_v19 = vmul.f32 %v511_v53, %v511_v53  ;;  %v575_v15 = vmul.f32 %v512_v30, %v512_v30  ;;  %v576_v14 = vmul.f32 %v513_v50, %v513_v50  ;;  %v3016_v50 = vld [vmem:[#allocation55_spill] sm:$0xff] }
  0xcc   : > { %v577_v13 = vmul.f32 %v514_v17, %v514_v17  ;;  %v578_v7 = vmul.f32 %v515_v55, %v515_v55  ;;  %v579_v11 = vmul.f32 %v516_v45, %v516_v45  ;;  %v2166_v54 = vmul.f32 %v517_v37, %v517_v37 }
  0xcd   : > { %v582_v10 = vadd.f32 %v528_v52, %v519_v16  ;;  %v587_v8 = vsel %vm334_vm0, %v573_v20, 0.0  ;;  %v595_v6 = vadd.f32 %v529_v23, %v520_v38  ;;  %v600_v4 = vsel %vm334_vm0, %v574_v19, 0.0 }
  0xce   : > { %v608_v3 = vadd.f32 %v530_v61, %v521_v39  ;;  %v613_v2 = vsel %vm334_vm0, %v575_v15, 0.0  ;;  %v621_v5 = vadd.f32 %v531_v57, %v522_v43  ;;  %v626_v0 = vsel %vm334_vm0, %v576_v14, 0.0  ;;  %v3017_v61 = vld [vmem:[#allocation56_spill] sm:$0xff]  ;;  %v3020_v14 = vld [vmem:[#allocation57_spill] sm:$0xff] }
  0xcf   : > { %v583_v1 = vadd.f32 %v582_v10, %v537_v33  ;;  %v634_v9 = vadd.f32 %v532_v42, %v523_v44  ;;  %v596_v53 = vadd.f32 %v595_v6, %v538_v28  ;;  %v639_v55 = vsel %vm334_vm0, %v577_v13, 0.0  ;;  %v3018_v33 = vld [vmem:[#allocation58_spill] sm:$0xff] }
  0xd0   : > { %v609_v30 = vadd.f32 %v608_v3, %v539_v58  ;;  %v647_v17 = vadd.f32 %v533_v36, %v3016_v50  ;;  %v622_v45 = vadd.f32 %v621_v5, %v540_v22  ;;  %v652_v38 = vsel %vm334_vm0, %v578_v7, 0.0  ;;  %v3019_v36 = vld [vmem:[#allocation60_spill] sm:$0xff]  ;;  %v3022_v10 = vld [vmem:[#allocation62_spill] sm:$0xff]  ;;  %v3024_v5 = vld [vmem:[#allocation63_spill] sm:$0xff] }
  0xd1   : > { %v584_v16 = vadd.f32 %v583_v1, %v546_v40  ;;  %v635_v37 = vadd.f32 %v634_v9, %v541_v48  ;;  %v597_v52 = vadd.f32 %v596_v53, %v547_v34  ;;  %v660_v43 = vadd.f32 %v3018_v33, %v3017_v61  ;;  %v3021_v34 = vld [vmem:[#allocation59_spill] sm:$0xff] }
  0xd2   : > { %v610_v39 = vadd.f32 %v609_v30, %v548_v51  ;;  %v648_v23 = vadd.f32 %v647_v17, %v542_v63  ;;  %v623_v20 = vadd.f32 %v622_v45, %v549_v56  ;;  %v665_v58 = vsel %vm334_vm0, %v579_v11, 0.0  ;;  %v3023_v11 = vld [vmem:[#allocation61_spill] sm:$0xff] }
  0xd3   : > { %v585_v57 = vadd.f32 %v584_v16, %v555_v59  ;;  %v636_v44 = vadd.f32 %v635_v37, %v550_v24  ;;  %v598_v42 = vadd.f32 %v597_v52, %v556_v18  ;;  %v661_v40 = vadd.f32 %v660_v43, %v3019_v36 }
  0xd4   : > { %v611_v28 = vadd.f32 %v610_v39, %v557_v60  ;;  %v649_v19 = vadd.f32 %v648_v23, %v551_v46  ;;  %v624_v48 = vadd.f32 %v623_v20, %v558_v49  ;;  %v673_v51 = vadd.f32 %v3021_v34, %v3020_v14 }
  0xd5   : > { %v586_v22 = vadd.f32 %v585_v57, %v564_v35  ;;  %v637_v15 = vadd.f32 %v636_v44, %v559_v62  ;;  %v599_v63 = vadd.f32 %v598_v42, %v565_v26  ;;  %v662_v59 = vadd.f32 %v661_v40, %v3022_v10 }
  0xd6   : > { %v612_v13 = vadd.f32 %v611_v28, %v566_v27  ;;  %v650_v7 = vadd.f32 %v649_v19, %v560_v29  ;;  %v625_v24 = vadd.f32 %v624_v48, %v567_v31  ;;  %v674_v18 = vadd.f32 %v673_v51, %v3023_v11 }
  0xd7   : > { %v588_v56 = vadd.f32 %v587_v8, %v586_v22  ;;  %v638_v6 = vadd.f32 %v637_v15, %v568_v32  ;;  %v601_v60 = vadd.f32 %v600_v4, %v599_v63  ;;  %v663_v35 = vadd.f32 %v662_v59, %v2158_v41 }
  0xd8   : > { %v614_v46 = vadd.f32 %v613_v2, %v612_v13  ;;  %v651_v3 = vadd.f32 %v650_v7, %v569_v25  ;;  %v627_v62 = vadd.f32 %v626_v0, %v625_v24  ;;  %v675_v9 = vadd.f32 %v674_v18, %v3024_v5 }
  0xd9   : > { %v589_v49 = vrot.slane %v588_v56, 4  ;;  %v640_v1 = vadd.f32 %v639_v55, %v638_v6  ;;  %v602_v26 = vrot.slane %v601_v60, 4  ;;  %v664_v53 = vadd.f32 %v663_v35, %v2162_v47 }
  0xda   : > { %v615_v27 = vrot.slane %v614_v46, 4  ;;  %v653_v29 = vadd.f32 %v652_v38, %v651_v3  ;;  %v628_v31 = vrot.slane %v627_v62, 4  ;;  %v676_v30 = vadd.f32 %v675_v9, %v2160_v12 }
  0xdb   : > { %v590_v8 = vadd.f32 %v589_v49, %v588_v56  ;;  %v641_v32 = vrot.slane %v640_v1, 4  ;;  %v603_v4 = vadd.f32 %v602_v26, %v601_v60  ;;  %v666_v50 = vadd.f32 %v665_v58, %v664_v53 }
  0xdc   : > { %v616_v2 = vadd.f32 %v615_v27, %v614_v46  ;;  %v654_v25 = vrot.slane %v653_v29, 4  ;;  %v629_v17 = vadd.f32 %v628_v31, %v627_v62  ;;  %v677_v55 = vadd.f32 %v676_v30, %v2164_v21  ;;  %v2197_v31 = vld [vmem:[%s1764_s7 + $0x88] sm:$0xff] }
  0xdd   : > { %v591_v41 = vrot.slane %v590_v8, 2  ;;  %v642_v0 = vadd.f32 %v641_v32, %v640_v1  ;;  %v604_v16 = vrot.slane %v603_v4, 2  ;;  %v667_v38 = vrot.slane %v666_v50, 4  ;;  %3027 = vst [vmem:[#allocation65_spill] sm:$0xff] %v2197_v31 }
  0xde   : > { %v617_v45 = vrot.slane %v616_v2, 2  ;;  %v655_v37 = vadd.f32 %v654_v25, %v653_v29  ;;  %v630_v47 = vrot.slane %v629_v17, 2  ;;  %v678_v23 = vsel %vm334_vm0, %v2166_v54, 0.0 }
  0xdf   : > { %v592_v52 = vadd.f32 %v591_v41, %v590_v8  ;;  %v643_v39 = vrot.slane %v642_v0, 2  ;;  %v605_v12 = vadd.f32 %v604_v16, %v603_v4  ;;  %v668_v43 = vadd.f32 %v667_v38, %v666_v50  ;;  %v2194_v8 = vld [vmem:[%s1764_s7 + $0x40] sm:$0xff]  ;;  %v2203_v50 = vld [vmem:[%s1764_s7 + $0xd0] sm:$0xff] }
  0xe0   : > { %v618_v61 = vadd.f32 %v617_v45, %v616_v2  ;;  %v656_v33 = vrot.slane %v655_v37, 2  ;;  %v631_v20 = vadd.f32 %v630_v47, %v629_v17  ;;  %v679_v58 = vadd.f32 %v678_v23, %v677_v55  ;;  %3026 = vst [vmem:[#allocation64_spill] sm:$0xff] %v2194_v8  ;;  %3029 = vst [vmem:[#allocation67_spill] sm:$0xff] %v2203_v50  ;;  %v726_v41 = vld [vmem:[%s1774_s17] sm:$0xff]  ;;  %v2211_v45 = vld [vmem:[%s1764_s7 + $0x118] sm:$0xff] }
  0xe1   : > { %v593_v57 = vrot.slane %v592_v52, 1  ;;  %v644_v44 = vadd.f32 %v643_v39, %v642_v0  ;;  %v606_v42 = vrot.slane %v605_v12, 1  ;;  %v669_v19 = vrot.slane %v668_v43, 2  ;;  %3030 = vst [vmem:[#allocation55_spill] sm:$0xff] %v2211_v45 }
  0xe2   : > { %v619_v21 = vrot.slane %v618_v61, 1  ;;  %v657_v28 = vadd.f32 %v656_v33, %v655_v37  ;;  %v632_v40 = vrot.slane %v631_v20, 1  ;;  %v680_v48 = vrot.slane %v679_v58, 4 }
  0xe3   : > { %v594_v36 = vadd.f32 %v593_v57, %v592_v52  ;;  %v645_v22 = vrot.slane %v644_v44, 1  ;;  %v607_v15 = vadd.f32 %v606_v42, %v605_v12  ;;  %v670_v54 = vadd.f32 %v669_v19, %v668_v43  ;;  %v2218_v12 = vld [vmem:[%s1764_s7 + $0x160] sm:$0xff]  ;;  %v2225_v57 = vld [vmem:[%s1764_s7 + $0x1f0] sm:$0x1]  ;;  %v2232_v42 = vld [vmem:[%s1764_s7 + $0x1a8] sm:$0xff] }
  0xe4   : > { %v620_v14 = vadd.f32 %v619_v21, %v618_v61  ;;  %v658_v34 = vrot.slane %v657_v28, 1  ;;  %v633_v51 = vadd.f32 %v632_v40, %v631_v20  ;;  %v681_v13 = vadd.f32 %v680_v48, %v679_v58 }
  0xe5   : > { %v646_v63 = vadd.f32 %v645_v22, %v644_v44  ;;  %v699_v7 = vmul.f32 0.020408163, %v594_v36  ;;  %v671_v59 = vrot.slane %v670_v54, 1  ;;  %v700_v56 = vmul.f32 0.020408163, %v607_v15 }
  0xe6   : > { %v659_v10 = vadd.f32 %v658_v34, %v657_v28  ;;  %v701_v24 = vmul.f32 0.020408163, %v620_v14  ;;  %v682_v6 = vrot.slane %v681_v13, 2  ;;  %v702_v11 = vmul.f32 0.020408163, %v633_v51 }
  0xe7   : > { %v703_v18 = vmul.f32 0.020408163, %v646_v63  ;;  %v672_v60 = vadd.f32 %v671_v59, %v670_v54  ;;  %v708_v3 = vadd.f32 1e-05, %v699_v7  ;;  %v709_v35 = vadd.f32 1e-05, %v700_v56 }
  0xe8   : > { %v704_v46 = vmul.f32 0.020408163, %v659_v10  ;;  %v683_v49 = vadd.f32 %v682_v6, %v681_v13  ;;  %v710_v62 = vadd.f32 1e-05, %v701_v24  ;;  %v711_v1 = vadd.f32 1e-05, %v702_v11 }
  0xe9   : > { %v3025_v5 = vlaneseq  ;;  %v705_v26 = vmul.f32 0.020408163, %v672_v60  ;;  %v712_v27 = vadd.f32 1e-05, %v703_v18  ;;  %1356 = vrsqrt.f32 %v708_v3  ;;  %v3032_v59 = vld [vmem:[#allocation68_spill] sm:$0xff]  ;;  %v3034_v18 = vld [vmem:[#allocation69_spill] sm:$0xff] }
  0xea   : > { %v684_v29 = vrot.slane %v683_v49, 1  ;;  %v713_v53 = vadd.f32 1e-05, %v704_v46  ;;  %1358 = vrsqrt.f32 %v709_v35  ;;  %v1555_v2 = vmov 1966171168  }
  0xeb   : > { %v2191_v9 = vshrl.u32 %v3025_v5, 7  ;;  %v714_v32 = vadd.f32 1e-05, %v705_v26  ;;  %1360 = vrsqrt.f32 %v710_v62  ;;  %v809_v25 = vunpack.c.l.s4 %v1555_v2  ;;  %v3036_v62 = vld [vmem:[#allocation70_spill] sm:$0xff]  ;;  %v3037_v5 = vld [vmem:[#allocation12_spill] sm:$0xff] }
  0xec   : > { %v685_v30 = vadd.f32 %v684_v29, %v683_v49  ;;  %1362 = vrsqrt.f32 %v711_v1  ;;  %v434_v0 = vadd.f32 %v2197_v31, %v2194_v8  ;;  %v439_v15 = vsel %vm334_vm0, %v2225_v57, 0.0 }
  0xed   : > { %v2200_v4 = vsub.s32 0, %v2191_v9  ;;  %1364 = vrsqrt.f32 %v712_v27  ;;  %v2872_v17 = vsub.s32 1, %v2191_v9  ;;  %v2871_v16 = vsub.s32 2, %v2191_v9 }
  0xee   : > { %v706_v55 = vmul.f32 0.020408163, %v685_v30  ;;  %1366 = vrsqrt.f32 %v713_v53  ;;  %v2870_v37 = vsub.s32 3, %v2191_v9  ;;  %v435_v38 = vadd.f32 %v434_v0, %v2203_v50 }
  0xef   : > { %3028 = vst [vmem:[#allocation66_spill] sm:$0xff] %v2200_v4  ;;  %1368 = vrsqrt.f32 %v714_v32  ;;  %v733_v47 = vrot.slane %v726_v41, %v2200_v4  ;;  %v2869_v39 = vsub.s32 4, %v2191_v9  ;;  %v810_v23 = vunpack.c.0.s8 %v809_v25  ;;  %v3039_v32 = vld [vmem:[#allocation71_spill] sm:$0xff]  ;;  %v3040_v25 = vld [vmem:[#allocation13_spill] sm:$0xff] }
  0xf0   : > { %v715_v52 = vadd.f32 1e-05, %v706_v55  ;;  %v737_v61 = vrot.slane %v726_v41, %v2872_v17  ;;  %v2868_v33 = vsub.s32 5, %v2191_v9  ;;  %v2867_v43 = vsub.s32 6, %v2191_v9  ;;  %v3041_v55 = vld [vmem:[#allocation72_spill] sm:$0xff] }
  0xf1   : > { %v436_v20 = vadd.f32 %v435_v38, %v2211_v45  ;;  %v741_v44 = vrot.slane %v726_v41, %v2871_v16  ;;  %v2866_v58 = vsub.s32 7, %v2191_v9  ;;  %v745_v28 = vrot.slane %v726_v41, %v2870_v37  ;;  %v3084_v16 = vld [vmem:[#allocation46_spill] sm:$0xff] }
  0xf2   : > { %1370 = vrsqrt.f32 %v715_v52  ;;  %v749_v40 = vrot.slane %v726_v41, %v2869_v39  ;;  %v2240_v48 = vsub.s32 %v810_v23, %v2191_v9  ;;  %v753_v34 = vrot.slane %v726_v41, %v2868_v33  ;;  %v3042_v52 = vld [vmem:[#allocation14_spill] sm:$0xff]  ;;  %v3079_v33 = vld [vmem:[#allocation43_spill] sm:$0xff] }
  0xf3   : > { %v1357_v21 = vpop.eup %1356  ;;  %v437_v19 = vadd.f32 %v436_v20, %v2218_v12  ;;  %v757_v54 = vrot.slane %v726_v41, %v2867_v43  ;;  %v761_v7 = vrot.slane %v726_v41, %v2866_v58 }
  0xf4   : > { %v1359_v36 = vpop.eup %1358  ;;  %v775_v22 = vmul.f32 %v1357_v21, %v733_v47  ;;  %3031 = vst [vmem:[#allocation56_spill] sm:$0xff] %v2240_v48 }
  0xf5   : > { %v1361_v14 = vpop.eup %1360  ;;  %v776_v51 = vmul.f32 %v1359_v36, %v737_v61  ;;  %v438_v63 = vadd.f32 %v437_v19, %v2232_v42  ;;  %v3044_v61 = vld [vmem:[#allocation73_spill] sm:$0xff]  ;;  %v3046_v36 = vld [vmem:[#allocation74_spill] sm:$0xff] }
  0xf6   : > { %v1363_v13 = vpop.eup %1362  ;;  %v777_v10 = vmul.f32 %v1361_v14, %v741_v44  ;;  %v786_v56 = vmul.f32 %v775_v22, %v3032_v59  ;;  %v2253_v24 = vrot.slane %v775_v22, %v2200_v4  ;;  %v3047_v22 = vld [vmem:[#allocation15_spill] sm:$0xff]  ;;  %v3051_v59 = vld [vmem:[#allocation17_spill] sm:$0xff] }
  0xf7   : > { %v1365_v6 = vpop.eup %1364  ;;  %v778_v11 = vmul.f32 %v1363_v13, %v745_v28  ;;  %v787_v60 = vmul.f32 %v776_v51, %v3034_v18  ;;  %v2257_v46 = vrot.slane %v776_v51, %v2200_v4  ;;  %v440_v3 = vadd.f32 %v439_v15, %v438_v63  ;;  %v3050_v13 = vld [vmem:[#allocation16_spill] sm:$0xff] }
  0xf8   : > { %3033 = vst [vmem:[#allocation58_spill] sm:$0xff] %v2253_v24  ;;  %v1367_v35 = vpop.eup %1366  ;;  %v779_v49 = vmul.f32 %v1365_v6, %v749_v40  ;;  %v788_v1 = vmul.f32 %v777_v10, %v3036_v62  ;;  %v2262_v26 = vmul.f32 %v2253_v24, %v3037_v5  ;;  %v2265_v27 = vrot.slane %v777_v10, %v2200_v4  ;;  %v3052_v6 = vld [vmem:[#allocation18_spill] sm:$0xff] }
  0xf9   : > { %3035 = vst [vmem:[#allocation60_spill] sm:$0xff] %v2257_v46  ;;  %v1369_v29 = vpop.eup %1368  ;;  %v780_v53 = vmul.f32 %v1367_v35, %v753_v34  ;;  %v789_v30 = vmul.f32 %v778_v11, %v3039_v32  ;;  %v804_v2 = vcombine.low %v786_v56, %v787_v60  ;;  %v2270_v41 = vmul.f32 %v2257_v46, %v3040_v25  ;;  %v3053_v60 = vld [vmem:[#allocation20_spill] sm:$0xff]  ;;  %v3058_v25 = vld [vmem:[#allocation23_spill] sm:$0xff] }
  0xfa   : > { %3038 = vst [vmem:[#allocation57_spill] sm:$0xff] %v2265_v27  ;;  %v781_v0 = vmul.f32 %v1369_v29, %v757_v54  ;;  %v790_v38 = vmul.f32 %v779_v49, %v3041_v55  ;;  %v2275_v47 = vmul.f32 %v2265_v27, %v3042_v52  ;;  %v2278_v23 = vrot.slane %v778_v11, %v2200_v4  ;;  %v3059_v52 = vld [vmem:[#allocation19_spill] sm:$0xff] }
  0xfb   : > { %v791_v20 = vmul.f32 %v780_v53, %v3044_v61  ;;  %v805_v44 = vcombine.low %v788_v1, %v789_v30  ;;  %v814_v21 = vrot.slane %v804_v2, %v2240_v48  ;;  %v2283_v28 = vrot.slane %v779_v49, %v2200_v4  ;;  %v3057_v30 = vld [vmem:[#allocation22_spill] sm:$0xff] }
  0xfc   : > { %3043 = vst [vmem:[#allocation59_spill] sm:$0xff] %v2278_v23  ;;  %v1371_v19 = vpop.eup %1370  ;;  %v792_v40 = vmul.f32 %v781_v0, %v3046_v36  ;;  %v2288_v15 = vmul.f32 %v2278_v23, %v3047_v22  ;;  %v2291_v14 = vrot.slane %v780_v53, %v2200_v4  ;;  %v2294_v34 = vrot.slane %v781_v0, %v2200_v4  ;;  %v3056_v53 = vld [vmem:[#allocation21_spill] sm:$0xff]  ;;  %v3062_v36 = vld [vmem:[#allocation26_spill] sm:$0xff] }
  0xfd   : > { %3045 = vst [vmem:[#allocation62_spill] sm:$0xff] %v2283_v28  ;;  %v782_v54 = vmul.f32 %v1371_v19, %v761_v7  ;;  %v806_v51 = vcombine.low %v790_v38, %v791_v20  ;;  %v821_v63 = vrot.slane %v805_v44, %v2240_v48  ;;  %v2299_v10 = vmul.f32 %v2283_v28, %v3050_v13  ;;  %v3054_v7 = vld [vmem:[#allocation75_spill] sm:$0xff] }
  0xfe   : > { %3048 = vst [vmem:[#allocation61_spill] sm:$0xff] %v2291_v14  ;;  %3049 = vst [vmem:[#allocation63_spill] sm:$0xff] %v2294_v34  ;;  %v2303_v56 = vmul.f32 %v2291_v14, %v3051_v59  ;;  %v2307_v11 = vmul.f32 %v2294_v34, %v3052_v6  ;;  %v441_v18 = vrot.slane %v440_v3, 4  ;;  %v2311_v35 = vmul.f32 %v2253_v24, %v3053_v60  ;;  %v3065_v59 = vld [vmem:[#allocation29_spill] sm:$0xff] }
  0xff   : > { %v793_v49 = vmul.f32 %v782_v54, %v3054_v7  ;;  %v828_v62 = vrot.slane %v806_v51, %v2240_v48  ;;  %v836_v1 = vcombine.low %v814_v21, %v821_v63  ;;  %v2316_v5 = vrot.slane %v782_v54, %v2200_v4  ;;  %v3061_v21 = vld [vmem:[#allocation25_spill] sm:$0xff]  ;;  %v3064_v63 = vld [vmem:[#allocation28_spill] sm:$0xff] }
 0x100   : > { %v442_v29 = vadd.f32 %v441_v18, %v440_v3  ;;  %v2320_v32 = vmul.f32 %v2257_v46, %v3056_v53  ;;  %v2324_v2 = vmul.f32 %v2265_v27, %v3057_v30  ;;  %v2328_v0 = vmul.f32 %v2278_v23, %v3058_v25  ;;  %v3060_v3 = vld [vmem:[#allocation24_spill] sm:$0xff]  ;;  %v3066_v18 = vld [vmem:[#allocation30_spill] sm:$0xff]  ;;  %v3069_v25 = vld [vmem:[#allocation33_spill] sm:$0xff] }
 0x101   : > { %3055 = vst [vmem:[#allocation68_spill] sm:$0xff] %v2316_v5  ;;  %v807_v55 = vcombine.low %v792_v40, %v793_v49  ;;  %v844_v38 = vrot.slane %v836_v1, %v2240_v48  ;;  %v2333_v61 = vmul.f32 %v2316_v5, %v3059_v52  ;;  %v2337_v20 = vmul.f32 %v2283_v28, %v3060_v3  ;;  %v3063_v40 = vld [vmem:[#allocation27_spill] sm:$0xff]  ;;  %v3068_v53 = vld [vmem:[#allocation32_spill] sm:$0xff]  ;;  %v3070_v3 = vld [vmem:[#allocation34_spill] sm:$0xff] }
 0x102   : > { %v443_v44 = vrot.slane %v442_v29, 2  ;;  %v2341_v19 = vmul.f32 %v2291_v14, %v3061_v21  ;;  %v2345_v22 = vmul.f32 %v2294_v34, %v3062_v36  ;;  %v2349_v54 = vmul.f32 %v2316_v5, %v3063_v40  ;;  %v3067_v49 = vld [vmem:[#allocation31_spill] sm:$0xff] }
 0x103   : > { %v835_v51 = vrot.slane %v807_v55, %v2240_v48  ;;  %v2354_v13 = vmul.f32 %v2253_v24, %v3064_v63  ;;  %v2358_v6 = vmul.f32 %v2257_v46, %v3065_v59  ;;  %v2362_v60 = vmul.f32 %v2265_v27, %v3066_v18  ;;  %v3071_v36 = vld [vmem:[#allocation35_spill] sm:$0xff]  ;;  %v3073_v59 = vld [vmem:[#allocation37_spill] sm:$0xff] }
 0x104   : > { %v444_v7 = vadd.f32 %v443_v44, %v442_v29  ;;  %v2366_v1 = vmul.f32 %v2278_v23, %v3067_v49  ;;  %v2370_v30 = vmul.f32 %v2283_v28, %v3068_v53  ;;  %v2374_v55 = vmul.f32 %v2291_v14, %v3069_v25  ;;  %v3072_v44 = vld [vmem:[#allocation36_spill] sm:$0xff]  ;;  %v3074_v49 = vld [vmem:[#allocation38_spill] sm:$0xff] }
 0x105   : > { %v837_v52 = vcombine.low %v828_v62, %v835_v51  ;;  %v2378_v21 = vmul.f32 %v2294_v34, %v3070_v3  ;;  %v2382_v29 = vmul.f32 %v2316_v5, %v3071_v36  ;;  %v2386_v40 = vmul.f32 %v2253_v24, %v3072_v44  ;;  %v3075_v51 = vld [vmem:[#allocation39_spill] sm:$0xff]  ;;  %v3076_v3 = vld [vmem:[#allocation40_spill] sm:$0xff]  ;;  %v3077_v44 = vld [vmem:[#allocation41_spill] sm:$0xff] }
 0x106   : > { %v445_v63 = vrot.slane %v444_v7, 1  ;;  %v2390_v18 = vmul.f32 %v2257_v46, %v3073_v59  ;;  %v2394_v62 = vmul.f32 %v2265_v27, %v3074_v49  ;;  %v2398_v53 = vmul.f32 %v2278_v23, %v3075_v51  ;;  %v3078_v59 = vld [vmem:[#allocation42_spill] sm:$0xff]  ;;  %v784_v49 = vld [vmem:[%s2415_s22] sm:$0xff] }
 0x107   : > { %v851_v25 = vrot.slane %v837_v52, %v2240_v48  ;;  %v2403_v36 = vmul.f32 %v2283_v28, %v3076_v3  ;;  %v2407_v58 = vmul.f32 %v2291_v14, %v3077_v44  ;;  %v2411_v43 = vmul.f32 %v2294_v34, %v3078_v59  ;;  %v3081_v3 = vld [vmem:[#allocation44_spill] sm:$0xff]  ;;  %v3083_v44 = vld [vmem:[#allocation45_spill] sm:$0xff]  ;;  %v3085_v48 = vld [vmem:[#allocation47_spill] sm:$0xff] }
 0x108   : > { %v446_v51 = vadd.f32 %v445_v63, %v444_v7  ;;  %v2420_v52 = vmul.f32 %v2316_v5, %v3079_v33  ;;  %v2424_v39 = vmul.f32 %v2253_v24, %v3081_v3  ;;  %v2428_v37 = vmul.f32 %v2257_v46, %v3083_v44  ;;  %v3087_v63 = vld [vmem:[#allocation48_spill] sm:$0xff]  ;;  %v3088_v3 = vld [vmem:[#allocation49_spill] sm:$0xff]  ;;  %v3089_v44 = vld [vmem:[#allocation50_spill] sm:$0xff] }
 0x109   : > { %v852_v59 = vcombine.low %v844_v38, %v851_v25  ;;  %v2432_v17 = vmul.f32 %v2265_v27, %v3084_v16  ;;  %v2436_v7 = vmul.f32 %v2278_v23, %v3085_v48  ;;  %v2440_v33 = vmul.f32 %v2283_v28, %v3087_v63  ;;  %v3090_v16 = vld [vmem:[#allocation51_spill] sm:$0xff]  ;;  %v3091_v23 = vld [vmem:[#allocation52_spill] sm:$0xff]  ;;  %v3092_v63 = vld [vmem:[#allocation53_spill] sm:$0xff] }
 0x10a   : > { %3080 = vst [vmem:[#allocation69_spill] sm:$0xff] %v2420_v52  ;;  %3082 = vst [vmem:[#allocation70_spill] sm:$0xff] %v2424_v39  ;;  %v2442_v52 = vmul.f32 0.020408163, %v446_v51  ;;  %v2446_v39 = vmul.f32 %v2291_v14, %v3088_v3  ;;  %v2450_v38 = vmul.f32 %v2294_v34, %v3089_v44  ;;  %v2454_v25 = vmul.f32 %v2316_v5, %v3090_v16  ;;  %v3093_v28 = vld [vmem:[#allocation54_spill] sm:$0xff] }
 0x10b   : > { %3086 = vst [vmem:[#allocation12_spill] sm:$0xff] %v2436_v7  ;;  %v869_v48 = vsub.f32 %v784_v49, %v852_v59  ;;  %v2458_v7 = vmul.f32 %v2253_v24, %v3091_v23  ;;  %v2462_v51 = vmul.f32 %v2257_v46, %v3092_v63  ;;  %v2466_v3 = vmul.f32 %v2265_v27, %v3093_v28 }
 0x10c   : > { %v464_v44 = vsub.f32 %v2194_v8, %v2442_v52  ;;  %v473_v16 = vsub.f32 %v2197_v31, %v2442_v52  ;;  %v482_v49 = vsub.f32 %v2203_v50, %v2442_v52  ;;  %v491_v23 = vsub.f32 %v2211_v45, %v2442_v52 }
 0x10d   : > { %v2477_v59 = vrot.slane %v869_v48, %v2200_v4  ;;  %v3094_v63 = vsub.s32 1, %v2191_v9  ;;  %v3095_v27 = vsub.s32 2, %v2191_v9  ;;  %v3096_v31 = vsub.s32 3, %v2191_v9 }
 0x10e   : > { %v3097_v50 = vsub.s32 4, %v2191_v9  ;;  %v3098_v45 = vsub.s32 5, %v2191_v9  ;;  %v3099_v5 = vsub.s32 6, %v2191_v9  ;;  %v3100_v34 = vsub.s32 7, %v2191_v9 }
 0x10f   : > { %v2481_v28 = vrot.slane %v869_v48, %v3094_v63  ;;  %v2485_v8 = vrot.slane %v869_v48, %v3095_v27  ;;  %v2489_v46 = vrot.slane %v869_v48, %v3096_v31  ;;  %v1017_v31 = vadd.f32 %v2477_v59, %v2262_v26 }
 0x110   : > { %v2493_v24 = vrot.slane %v869_v48, %v3097_v50  ;;  %v2497_v4 = vrot.slane %v869_v48, %v3098_v45  ;;  %v2501_v63 = vrot.slane %v869_v48, %v3099_v5  ;;  %v2505_v27 = vrot.slane %v869_v48, %v3100_v34 }
 0x111   : > { %v1018_v14 = vadd.f32 %v2481_v28, %v2270_v41  ;;  %v1019_v50 = vadd.f32 %v2485_v8, %v2275_v47  ;;  %v1020_v45 = vadd.f32 %v2489_v46, %v2288_v15  ;;  %1080 = vst [vmem:[%s2525_s29] sm:$0xff] %v1017_v31  ;;  %v500_v41 = vsub.f32 %v2218_v12, %v2442_v52 }
 0x112   : > { %v1021_v5 = vadd.f32 %v2493_v24, %v2299_v10  ;;  %v1022_v9 = vadd.f32 %v2497_v4, %v2303_v56  ;;  %v1023_v34 = vadd.f32 %v2501_v63, %v2307_v11  ;;  %v1024_v26 = vadd.f32 %v2505_v27, %v2333_v61 }
 0x113   : > { %1081 = vst [vmem:[%s2525_s29 + $0x8] sm:$0xff] %v1018_v14  ;;  %1082 = vst [vmem:[%s2525_s29 + $0x10] sm:$0xff] %v1019_v50  ;;  %v509_v47 = vsub.f32 %v2232_v42, %v2442_v52  ;;  %v518_v15 = vsub.f32 %v2225_v57, %v2442_v52  ;;  %v527_v10 = vmul.f32 %v464_v44, %v464_v44 }
 0x114   : > { %1083 = vst [vmem:[%s2525_s29 + $0x18] sm:$0xff] %v1020_v45  ;;  %1084 = vst [vmem:[%s2525_s29 + $0x20] sm:$0xff] %v1021_v5  ;;  %v536_v56 = vmul.f32 %v473_v16, %v473_v16  ;;  %v545_v14 = vmul.f32 %v482_v49, %v482_v49  ;;  %v554_v11 = vmul.f32 %v491_v23, %v491_v23 }
 0x115   : > { %1085 = vst [vmem:[%s2525_s29 + $0x28] sm:$0xff] %v1022_v9  ;;  %1086 = vst [vmem:[%s2525_s29 + $0x30] sm:$0xff] %v1023_v34  ;;  %v1026_v61 = vadd.f32 %v2477_v59, %v2311_v35  ;;  %v563_v48 = vmul.f32 %v500_v41, %v500_v41  ;;  %v572_v31 = vmul.f32 %v509_v47, %v509_v47 }
 0x116   : > { %1087 = vst [vmem:[%s2525_s29 + $0x38] sm:$0xff] %v1024_v26  ;;  %v581_v50 = vmul.f32 %v518_v15, %v518_v15  ;;  %v1027_v44 = vadd.f32 %v2481_v28, %v2320_v32  ;;  %v686_v45 = vadd.f32 %v536_v56, %v527_v10  ;;  %v1028_v16 = vadd.f32 %v2485_v8, %v2324_v2 }
 0x117   : > { %1089 = vst [vmem:[%s2525_s29 + $0x48] sm:$0xff] %v1026_v61  ;;  %v1029_v49 = vadd.f32 %v2489_v46, %v2328_v0  ;;  %v1030_v35 = vadd.f32 %v2493_v24, %v2337_v20  ;;  %v1031_v32 = vadd.f32 %v2497_v4, %v2341_v19  ;;  %v1032_v5 = vadd.f32 %v2501_v63, %v2345_v22 }
 0x118   : > { %v2553_v23 = vsel %vm334_vm0, %v581_v50, 0.0  ;;  %1090 = vst [vmem:[%s2525_s29 + $0x50] sm:$0xff] %v1027_v44  ;;  %v1033_v2 = vadd.f32 %v2505_v27, %v2349_v54  ;;  %v687_v9 = vadd.f32 %v686_v45, %v545_v14  ;;  %1091 = vst [vmem:[%s2525_s29 + $0x58] sm:$0xff] %v1028_v16  ;;  %v1035_v0 = vadd.f32 %v2477_v59, %v2354_v13  ;;  %v1376_v44 = vld [vmem:[%s1764_s7 + $0x190] sm:$0xff]  ;;  %v1377_v16 = vld [vmem:[%s1764_s7 + $0x198] sm:$0xff] }
 0x119   : > { %1092 = vst [vmem:[%s2525_s29 + $0x60] sm:$0xff] %v1029_v49  ;;  %1093 = vst [vmem:[%s2525_s29 + $0x68] sm:$0xff] %v1030_v35  ;;  %v1036_v20 = vadd.f32 %v2481_v28, %v2358_v6  ;;  %v1037_v19 = vadd.f32 %v2485_v8, %v2362_v60  ;;  %v1038_v22 = vadd.f32 %v2489_v46, %v2366_v1  ;;  %v3107_v49 = vld [vmem:[#allocation63_spill] sm:$0xff] }
 0x11a   : > { %1094 = vst [vmem:[%s2525_s29 + $0x70] sm:$0xff] %v1031_v32  ;;  %1095 = vst [vmem:[%s2525_s29 + $0x78] sm:$0xff] %v1032_v5  ;;  %v1039_v54 = vadd.f32 %v2493_v24, %v2370_v30  ;;  %v1040_v13 = vadd.f32 %v2497_v4, %v2374_v55  ;;  %v1041_v6 = vadd.f32 %v2501_v63, %v2378_v21  ;;  %v3108_v32 = vld [vmem:[#allocation68_spill] sm:$0xff] }
 0x11b   : > { %1096 = vst [vmem:[%s2525_s29 + $0x80] sm:$0xff] %v1033_v2  ;;  %v688_v34 = vadd.f32 %v687_v9, %v554_v11  ;;  %1098 = vst [vmem:[%s2525_s29 + $0x90] sm:$0xff] %v1035_v0  ;;  %v1042_v60 = vadd.f32 %v2505_v27, %v2382_v29  ;;  %v1044_v1 = vadd.f32 %v2477_v59, %v2386_v40  ;;  %v1374_v11 = vld [vmem:[%s1764_s7 + $0x180] sm:$0xff]  ;;  %v1379_v2 = vld [vmem:[%s1764_s7 + $0x1b0] sm:$0x1] }
 0x11c   : > { %1099 = vst [vmem:[%s2525_s29 + $0x98] sm:$0xff] %v1036_v20  ;;  %1100 = vst [vmem:[%s2525_s29 + $0xa0] sm:$0xff] %v1037_v19  ;;  %v1045_v30 = vadd.f32 %v2481_v28, %v2390_v18  ;;  %v1046_v55 = vadd.f32 %v2485_v8, %v2394_v62  ;;  %v1047_v21 = vadd.f32 %v2489_v46, %v2398_v53  ;;  %v3101_v62 = vld [vmem:[#allocation69_spill] sm:$0xff]  ;;  %v3102_v53 = vld [vmem:[#allocation70_spill] sm:$0xff] }
 0x11d   : > { %1101 = vst [vmem:[%s2525_s29 + $0xa8] sm:$0xff] %v1038_v22  ;;  %1102 = vst [vmem:[%s2525_s29 + $0xb0] sm:$0xff] %v1039_v54  ;;  %v1048_v29 = vadd.f32 %v2493_v24, %v2403_v36  ;;  %v1049_v40 = vadd.f32 %v2497_v4, %v2407_v58  ;;  %v689_v18 = vadd.f32 %v688_v34, %v563_v48  ;;  %v3103_v36 = vld [vmem:[#allocation12_spill] sm:$0xff]  ;;  %v3109_v9 = vld [vmem:[#allocation58_spill] sm:$0xff] }
 0x11e   : > { %1103 = vst [vmem:[%s2525_s29 + $0xb8] sm:$0xff] %v1040_v13  ;;  %1104 = vst [vmem:[%s2525_s29 + $0xc0] sm:$0xff] %v1041_v6  ;;  %v1050_v26 = vadd.f32 %v2501_v63, %v2411_v43  ;;  %v1051_v41 = vadd.f32 %v2505_v27, %v3101_v62  ;;  %v1053_v47 = vadd.f32 %v2477_v59, %v3102_v53  ;;  %v1380_v20 = vld [vmem:[%s1764_s7 + $0x1b8] sm:$0x1]  ;;  %v3110_v19 = vld [vmem:[#allocation60_spill] sm:$0xff] }
 0x11f   : > { %1105 = vst [vmem:[%s2525_s29 + $0xc8] sm:$0xff] %v1042_v60  ;;  %1107 = vst [vmem:[%s2525_s29 + $0xd8] sm:$0xff] %v1044_v1  ;;  %v1054_v58 = vadd.f32 %v2481_v28, %v2428_v37  ;;  %v1055_v43 = vadd.f32 %v2485_v8, %v2432_v17  ;;  %v1056_v15 = vadd.f32 %v2489_v46, %v3103_v36  ;;  %v1383_v62 = vld [vmem:[%s1764_s7 + $0x1d0] sm:$0x1] }
 0x120   : > { %1108 = vst [vmem:[%s2525_s29 + $0xe0] sm:$0xff] %v1045_v30  ;;  %1109 = vst [vmem:[%s2525_s29 + $0xe8] sm:$0xff] %v1046_v55  ;;  %v1057_v10 = vadd.f32 %v2493_v24, %v2440_v33  ;;  %v690_v56 = vadd.f32 %v689_v18, %v572_v31  ;;  %v1058_v37 = vadd.f32 %v2497_v4, %v2446_v39  ;;  %v3105_v31 = vld [vmem:[#allocation62_spill] sm:$0xff]  ;;  %v1382_v18 = vld [vmem:[%s1764_s7 + $0x1c8] sm:$0x1] }
 0x121   : > { %1110 = vst [vmem:[%s2525_s29 + $0xf0] sm:$0xff] %v1047_v21  ;;  %1111 = vst [vmem:[%s2525_s29 + $0xf8] sm:$0xff] %v1048_v29  ;;  %v1059_v17 = vadd.f32 %v2501_v63, %v2450_v38  ;;  %v1060_v14 = vadd.f32 %v2505_v27, %v2454_v25  ;;  %v1062_v33 = vadd.f32 %v2477_v59, %v2458_v7  ;;  %v3104_v25 = vld [vmem:[#allocation59_spill] sm:$0xff]  ;;  %v3111_v21 = vld [vmem:[#allocation57_spill] sm:$0xff] }
 0x122   : > { %1112 = vst [vmem:[%s2525_s29 + $0x100] sm:$0xff] %v1049_v40  ;;  %1113 = vst [vmem:[%s2525_s29 + $0x108] sm:$0xff] %v1050_v26  ;;  %v1063_v39 = vadd.f32 %v2481_v28, %v2462_v51  ;;  %v1064_v38 = vadd.f32 %v2485_v8, %v2466_v3  ;;  %v955_v61 = vmul.f32 %v1374_v11, %v3104_v25  ;;  %v1375_v7 = vld [vmem:[%s1764_s7 + $0x188] sm:$0xff]  ;;  %v1381_v55 = vld [vmem:[%s1764_s7 + $0x1c0] sm:$0x1] }
 0x123   : > { %1114 = vst [vmem:[%s2525_s29 + $0x110] sm:$0xff] %v1051_v41  ;;  %1116 = vst [vmem:[%s2525_s29 + $0x120] sm:$0xff] %v1053_v47  ;;  %v692_v48 = vadd.f32 %v2553_v23, %v690_v56  ;;  %v956_v50 = vmul.f32 %v1375_v7, %v3105_v31  ;;  %v3106_v51 = vld [vmem:[#allocation61_spill] sm:$0xff]  ;;  %v958_v3 = vmul.f32 %v1377_v16, %v3107_v49  ;;  %v1378_v23 = vld [vmem:[%s1764_s7 + $0x1a0] sm:$0xff] }
 0x124   : > { %1117 = vst [vmem:[%s2525_s29 + $0x128] sm:$0xff] %v1054_v58  ;;  %1118 = vst [vmem:[%s2525_s29 + $0x130] sm:$0xff] %v1055_v43  ;;  %v957_v45 = vmul.f32 %v1376_v44, %v3106_v51  ;;  %v1065_v35 = vadd.f32 %v2489_v46, %v955_v61  ;;  %v959_v5 = vmul.f32 %v1378_v23, %v3108_v32  ;;  %v1385_v47 = vld [vmem:[%s1764_s7 + $0x1e0] sm:$0x1]  ;;  %v1386_v43 = vld [vmem:[%s1764_s7 + $0x1e8] sm:$0x1] }
 0x125   : > { %1119 = vst [vmem:[%s2525_s29 + $0x138] sm:$0xff] %v1056_v15  ;;  %1120 = vst [vmem:[%s2525_s29 + $0x140] sm:$0xff] %v1057_v10  ;;  %v961_v0 = vmul.f32 %v1379_v2, %v3109_v9  ;;  %v962_v22 = vmul.f32 %v1380_v20, %v3110_v19  ;;  %v693_v54 = vrot.slane %v692_v48, 4  ;;  %v1066_v13 = vadd.f32 %v2493_v24, %v956_v50  ;;  %v3113_v61 = vld [vmem:[#allocation56_spill] sm:$0xff] }
 0x126   : > { %1121 = vst [vmem:[%s2525_s29 + $0x148] sm:$0xff] %v1058_v37  ;;  %1122 = vst [vmem:[%s2525_s29 + $0x150] sm:$0xff] %v1059_v17  ;;  %v1067_v6 = vadd.f32 %v2497_v4, %v957_v45  ;;  %v1068_v34 = vadd.f32 %v2501_v63, %v958_v3  ;;  %v1069_v60 = vadd.f32 %v2505_v27, %v959_v5  ;;  %v785_v7 = vld [vmem:[%s2415_s22 + $0x8] sm:$0x1] }
 0x127   : > { %1123 = vst [vmem:[%s2525_s29 + $0x158] sm:$0xff] %v1060_v14  ;;  %1125 = vst [vmem:[%s2525_s29 + $0x168] sm:$0xff] %v1062_v33  ;;  %v1071_v1 = vadd.f32 %v2477_v59, %v961_v0  ;;  %v1072_v30 = vadd.f32 %v2481_v28, %v962_v22  ;;  %v963_v29 = vmul.f32 %v1381_v55, %v3111_v21  ;;  %v1384_v59 = vld [vmem:[%s1764_s7 + $0x1d8] sm:$0x1]  ;;  %v3114_v50 = vld [vmem:[#allocation64_spill] sm:$0xff] }
 0x128   : > { %1126 = vst [vmem:[%s2525_s29 + $0x170] sm:$0xff] %v1063_v39  ;;  %1127 = vst [vmem:[%s2525_s29 + $0x178] sm:$0xff] %v1064_v38  ;;  %v694_v40 = vadd.f32 %v693_v54, %v692_v48  ;;  %v964_v26 = vmul.f32 %v1382_v18, %v3104_v25  ;;  %v965_v41 = vmul.f32 %v1383_v62, %v3105_v31  ;;  %v1280_v38 = vld [vmem:[%s1774_s17 + $0x8] ss:$0 sm:$0xff]  ;;  %v3115_v45 = vld [vmem:[#allocation65_spill] sm:$0xff] }
 0x129   : > { %1128 = vst [vmem:[%s2525_s29 + $0x180] sm:$0xff] %v1065_v35  ;;  %1129 = vst [vmem:[%s2525_s29 + $0x188] sm:$0xff] %v1066_v13  ;;  %v966_v53 = vmul.f32 %v1384_v59, %v3106_v51  ;;  %v1073_v28 = vadd.f32 %v2485_v8, %v963_v29  ;;  %v967_v58 = vmul.f32 %v1385_v47, %v3107_v49  ;;  %v3116_v49 = vld [vmem:[#allocation67_spill] sm:$0xff] }
 0x12a   : > { %1130 = vst [vmem:[%s2525_s29 + $0x190] sm:$0xff] %v1067_v6  ;;  %1131 = vst [vmem:[%s2525_s29 + $0x198] sm:$0xff] %v1068_v34  ;;  %v968_v36 = vmul.f32 %v1386_v43, %v3108_v32  ;;  %v695_v15 = vrot.slane %v694_v40, 2  ;;  %v1074_v10 = vadd.f32 %v2489_v46, %v964_v26  ;;  %v1075_v56 = vadd.f32 %v2493_v24, %v965_v41  ;;  %v3117_v35 = vld [vmem:[#allocation55_spill] sm:$0xff] }
 0x12b   : > { %1132 = vst [vmem:[%s2525_s29 + $0x1a0] sm:$0xff] %v1069_v60  ;;  %1134 = vst [vmem:[%s2525_s29 + $0x1b0] sm:$0x1] %v1071_v1  ;;  %v1076_v37 = vadd.f32 %v2497_v4, %v966_v53  ;;  %v1077_v17 = vadd.f32 %v2501_v63, %v967_v58 }
 0x12c   : > { %1135 = vst [vmem:[%s2525_s29 + $0x1b8] sm:$0x1] %v1072_v30  ;;  %1136 = vst [vmem:[%s2525_s29 + $0x1c0] sm:$0x1] %v1073_v28  ;;  %v1078_v8 = vadd.f32 %v2505_v27, %v968_v36  ;;  %v696_v14 = vadd.f32 %v695_v15, %v694_v40  ;;  %v3112_v27 = vld [vmem:[#allocation66_spill] sm:$0xff] }
 0x12d   : > { %1137 = vst [vmem:[%s2525_s29 + $0x1c8] sm:$0x1] %v1074_v10  ;;  %1138 = vst [vmem:[%s2525_s29 + $0x1d0] sm:$0x1] %v1075_v56 }
 0x12e   : > { %1139 = vst [vmem:[%s2525_s29 + $0x1d8] sm:$0x1] %v1076_v37  ;;  %1140 = vst [vmem:[%s2525_s29 + $0x1e0] sm:$0x1] %v1077_v17  ;;  %v697_v33 = vrot.slane %v696_v14, 1 }
 0x12f   : > { %1141 = vst [vmem:[%s2525_s29 + $0x1e8] sm:$0x1] %v1078_v8 }
 0x130   : > { %v698_v46 = vadd.f32 %v697_v33, %v696_v14 }
 0x132   : > { %v707_v39 = vmul.f32 0.020408163, %v698_v46 }
 0x134   : > { %v716_v24 = vadd.f32 1e-05, %v707_v39 }
 0x136   : > { %1372 = vrsqrt.f32 %v716_v24 }
 0x140   : > { %v1373_v4 = vpop.eup %1372 }
 0x141   : > { %v783_v11 = vmul.f32 %v1373_v4, %v1280_v38 }
 0x143   : > { %v794_v63 = vmul.f32 %v783_v11, %v2442_v52  ;;  %v906_v25 = vrot.slane %v783_v11, %v3112_v27 }
 0x145   : > { %v859_v48 = vrot.slane %v794_v63, %v3113_v61  ;;  %v915_v44 = vmul.f32 %v906_v25, %v3114_v50  ;;  %v924_v16 = vmul.f32 %v906_v25, %v3115_v45  ;;  %v933_v3 = vmul.f32 %v906_v25, %v3116_v49 }
 0x146   : > { %v942_v23 = vmul.f32 %v906_v25, %v3117_v35  ;;  %v951_v52 = vmul.f32 %v906_v25, %v2218_v12  ;;  %v960_v32 = vmul.f32 %v906_v25, %v2232_v42  ;;  %v969_v5 = vmul.f32 %v906_v25, %v2225_v57 }
 0x147   : > { %v866_v31 = vrot.slane %v859_v48, %v3113_v61 }
 0x149   : > { %v870_v51 = vsub.f32 %v785_v7, %v866_v31 }
 0x14b   : > { %v1007_v2 = vrot.slane %v870_v51, %v3112_v27 }
 0x14d   : > { %v1025_v9 = vadd.f32 %v1007_v2, %v915_v44  ;;  %v1034_v12 = vadd.f32 %v1007_v2, %v924_v16  ;;  %v1043_v0 = vadd.f32 %v1007_v2, %v933_v3  ;;  %v1052_v42 = vadd.f32 %v1007_v2, %v942_v23 }
 0x14e   : > { %v1061_v57 = vadd.f32 %v1007_v2, %v951_v52  ;;  %v1070_v20 = vadd.f32 %v1007_v2, %v960_v32  ;;  %v1079_v19 = vadd.f32 %v1007_v2, %v969_v5 }
 0x14f   : > { %1088 = vst [vmem:[%s2525_s29 + $0x40] sm:$0xff] %v1025_v9  ;;  %1097 = vst [vmem:[%s2525_s29 + $0x88] sm:$0xff] %v1034_v12 }
 0x150   : > { %1106 = vst [vmem:[%s2525_s29 + $0xd0] sm:$0xff] %v1043_v0  ;;  %1115 = vst [vmem:[%s2525_s29 + $0x118] sm:$0xff] %v1052_v42 }
 0x151   : > { %1124 = vst [vmem:[%s2525_s29 + $0x160] sm:$0xff] %v1061_v57  ;;  %1133 = vst [vmem:[%s2525_s29 + $0x1a8] sm:$0xff] %v1070_v20 }
 0x152   : > { %1142 = vst [vmem:[%s2525_s29 + $0x1f0] sm:$0x1] %v1079_v19 }
 0x153   : > { %1490 = shalt.err (!%p1487_p10)
}
 0x154   : > { %s1491_s27 = scalar_lea.hbm %s2721_s9, 8064  ;;  %s1495_s7 = scalar_lea.hbm %s2777_s3, 16128 }
 0x155   : > { %p1492_p1 = scmp.ne.s32.totalorder %s2721_s9, %s1491_s27  ;;  %p1496_p7 = scmp.lt.u32.totalorder %s2721_s9, %s2777_s3 }
 0x156   : > { %p1497_p2 = scmp.lt.u32.totalorder %s1495_s7, %s1491_s27  ;;  %p1499_p3 = scmp.lt.u32.totalorder %s1491_s27, %s2721_s9 }
 0x157   : > { %p1493_p12 = pnand %p1492_p1, %p3118_p8 }
 0x158   : > { %p1498_p13 = por %p1497_p2, %p1496_p7 }
 0x159   : > { %p1494_p4 = pneg %p1493_p12 }
 0x15a   : > { %p1500_p9 = por %p1499_p3, %p1498_p13 }
 0x15c   : > { %p1501_p0 = pnand %p1500_p9, %p1494_p4 }
 0x15e   : > { %1504 = shalt.err (!%p1501_p0)
}
 0x15f   : > { %s1557_s11 = smov 1152   ;;  %s1558_s17 = smov 2304  }
 0x160   : > { %s1559_s22 = smov 72  }
 0x161   : > { %1299 = dma.vmem_to_hbm [thread:$0]  (%p3118_p8), %s2723_s30, 8064, %s2721_s9, %s1144_s5, %s1557_s11, %s1558_s17, %s1559_s22  }
 0x162 PF: > { %s1172_s29 = sand.u32 1, %s1535_s12   ;;  %p3119_p6 = scmp.ne.s32.totalorder %s2898_s24, 0 }
 0x163   : > { %p3120_p11 = scmp.ge.s32.totalorder %s1547_s15, 2  ;;  %s1173_s4 = scalar_lea.sflag [#allocation4], %s1172_s29 }
 0x165   : > { %p1312_p5 = pnand %p3120_p11, %p3119_p6 }
 0x167   : > { %1530 = dma.done.wait (!%p1312_p5), %s1173_s4, 8064  }
 0x168   : > { %1532 = vsyncadd (!%p1312_p5), %s1173_s4, 4294959232  ;;  %p19_p10 = scmp.ge.s32.totalorder %s1605_s18, 4   ;;  %s3121_s12 = smov %s1539_s13 }
 0x169   : > { %s3122_s13 = smov %s1543_s14  ;;  %s3123_s14 = smov %s1617_s21 }
 0x16a   : > { %s3124_s15 = smov %s1605_s18  ;;  %21 = sbr.rel (!%p19_p10) target bundleno = 10 (0xa), region = 101 }
 0x171   :  { %1178 = vsyncpa [#allocation3], 1 }
 0x172   :  { %1180 = vsyncpa [#allocation3 + $0x1], 1 }
 0x173   :  { %1181 = vsyncpa [#allocation6], 1 }
 0x174   :  { %1183 = vsyncpa [#allocation6 + $0x1], 1 }
 0x175   :  { %1184 = vsyncpa [#allocation4], 1 }
 0x176   :  { %1186 = vsyncpa [#allocation4 + $0x1], 1 }

</bundles_post_ra>
